<compile_context>
chip_gen: v7x
topology: tpu7x:2x2x1
jax: 0.10.0
libtpu: 0.0.40
codegen_flags: <defaults>
</compile_context>

<pallas_src>
from math import sqrt

import jax
import jax.numpy as jnp
from jax import lax
from jax.experimental import pallas as pl
from jax.experimental.pallas import tpu as pltpu


def _preprocess_kernel(a_ref, q_ref, wi_ref, wu_ref, wg_ref,
                       bi_ref, bu_ref, bg_ref, h_ref, g_ref):
    A = a_ref[...]        # (n, n)
    Q = q_ref[...]        # (n, n)
    Wi = wi_ref[...]      # (n, n)
    Wu = wu_ref[...]      # (n, n)
    Wg = wg_ref[...]      # (n, n)
    b_i = bi_ref[...]     # (1, n) row bias
    b_u = bu_ref[...]     # (1, n) row bias
    b_g = bg_ref[...]     # (n, 1) column bias (bias applied to the transposed product)

    wia = jnp.dot(Wi, A, preferred_element_type=jnp.float32)
    wua = jnp.dot(Wu, A, preferred_element_type=jnp.float32)
    wiq = jnp.dot(Wi, Q, preferred_element_type=jnp.float32)   # reused for q_i and q_u

    a_i = jax.nn.sigmoid(wia + b_i)
    a_u = jnp.tanh(wua + b_u)
    q_i = jax.nn.sigmoid(wiq + b_i)
    # upstream module reuses W_i and sigmoid for q_u — reproduced as-is
    q_u = jax.nn.sigmoid(wiq + b_u)

    _A = a_i * a_u
    _Q = q_i * q_u

    # (W_g @ _Q + bias_g)^T without an explicit transpose:
    #   gT[i, j] = sum_k _Q[k, i] * Wg[j, k] = (Wg @ _Q)[j, i]
    gT = lax.dot_general(_Q, Wg, dimension_numbers=(((0,), (1,)), ((), ())),
                         preferred_element_type=jnp.float32)
    g_pre = (gT + b_g) * _A

    # softmax over axis 1 (numerically stabilized); exact reciprocal to hold tolerance
    m = jnp.max(g_pre, axis=1, keepdims=True)
    e = jnp.exp(g_pre - m)
    G = e * pl.reciprocal(jnp.sum(e, axis=1, keepdims=True), approx=False)

    g_ref[...] = G
    h_ref[...] = _Q * G


@jax.jit
def preprocess_forward_batched(A, Q, W_i, W_u, W_g, b_i, b_u, b_g):
    """B independent PreProcess.forward problems sharing one set of weights.

    A, Q: (B, n, n) f32;  W_i, W_u, W_g: (n, n);  b_i, b_u, b_g: (n,).
    Returns (H, G), each (B, n, n).
    """
    B, dim, ans_seq = A.shape
    _, _, ques_seq = Q.shape
    n = dim
    assert dim == ans_seq == ques_seq == W_i.shape[1] == W_g.shape[0], (
        "PreProcess algebra requires dim == seq_len == ans_seq == ques_seq")

    # Square case: b.repeat(1, n).view(dim, n) == row broadcast of b; after the
    # transpose, b_g becomes a column broadcast.  No (n, n) bias matrices are built.
    b_i_row = b_i.reshape(1, n).astype(jnp.float32)
    b_u_row = b_u.reshape(1, n).astype(jnp.float32)
    b_g_col = b_g.reshape(n, 1).astype(jnp.float32)

    resident = lambda shape: pl.BlockSpec(shape, lambda b: (0, 0))   # same block every step
    per_batch = pl.BlockSpec((None, n, n), lambda b: (b, 0, 0))

    H, G = pl.pallas_call(
        _preprocess_kernel,
        out_shape=(jax.ShapeDtypeStruct((B, n, n), jnp.float32),
                   jax.ShapeDtypeStruct((B, n, n), jnp.float32)),
        grid_spec=pltpu.PrefetchScalarGridSpec(
            num_scalar_prefetch=0,
            grid=(B,),
            in_specs=[
                per_batch,                    # A   (one problem per grid step)
                per_batch,                    # Q
                resident(W_i.shape),          # W_i (stays resident across the grid)
                resident(W_u.shape),          # W_u
                resident(W_g.shape),          # W_g
                resident((1, n)),             # b_i row
                resident((1, n)),             # b_u row
                resident((n, 1)),             # b_g column
            ],
            out_specs=[per_batch, per_batch],
        ),
        compiler_params=pltpu.CompilerParams(
            dimension_semantics=("parallel",)),
    )(A, Q, W_i, W_u, W_g, b_i_row, b_u_row, b_g_col)
    return H, G


@jax.jit
def preprocess_forward(A, Q, W_i, W_u, W_g, b_i, b_u, b_g):
    """Module-equivalent single-sample forward: A, Q are (n, n)."""
    H, G = preprocess_forward_batched(A[None], Q[None], W_i, W_u, W_g, b_i, b_u, b_g)
    return H[0], G[0]


# ---------------- pure-JAX reference (exact torch semantics) ----------------

def _wrap_bias(b, dim, ncols):
    # torch: b.repeat(1, ncols).view(dim, ncols)
    return jnp.tile(b, ncols).reshape(dim, ncols)


def _reference_single(A, Q, W_i, W_u, W_g, b_i, b_u, b_g):
    dim, ans_seq = A.shape
    _, ques_seq = Q.shape
    a_i = jax.nn.sigmoid(W_i @ A + _wrap_bias(b_i, dim, ans_seq))
    a_u = jnp.tanh(W_u @ A + _wrap_bias(b_u, dim, ans_seq))
    q_i = jax.nn.sigmoid(W_i @ Q + _wrap_bias(b_i, dim, ques_seq))
    q_u = jax.nn.sigmoid(W_i @ Q + _wrap_bias(b_u, dim, ques_seq))
    _A = a_i * a_u
    _Q = q_i * q_u
    G = jax.nn.softmax((W_g @ _Q + _wrap_bias(b_g, dim, ques_seq)).T * _A, axis=1)
    H = _Q * G
    return H, G


if __name__ == "__main__":
    # Square shapes required by the module's algebra; n = 128 keeps lanes / MXU tiles
    # full (lane-dense, unmasked stores).  B independent problems give a real grid.
    n = 128
    B = 4

    key = jax.random.PRNGKey(0)
    k = jax.random.split(key, 8)
    stdv = 1.0 / sqrt(n)   # module's self.hidden_size is absent upstream; use seq_len
    uni = lambda kk, shape: jax.random.uniform(kk, shape, jnp.float32, -stdv, stdv)

    W_i = uni(k[0], (n, n))
    W_u = uni(k[1], (n, n))
    W_g = uni(k[2], (n, n))
    b_i = uni(k[3], (n,))
    b_u = uni(k[4], (n,))
    b_g = uni(k[5], (n,))

    A = jax.random.normal(k[6], (B, n, n), jnp.float32)
    Q = jax.random.normal(k[7], (B, n, n), jnp.float32)

    H, G = preprocess_forward_batched(A, Q, W_i, W_u, W_g, b_i, b_u, b_g)
    jax.block_until_ready((H, G))

    H_ref, G_ref = jax.vmap(
        _reference_single, in_axes=(0, 0, None, None, None, None, None, None)
    )(A, Q, W_i, W_u, W_g, b_i, b_u, b_g)
    assert jnp.allclose(H, H_ref, atol=2e-5, rtol=2e-5), float(jnp.max(jnp.abs(H - H_ref)))
    assert jnp.allclose(G, G_ref, atol=2e-5, rtol=2e-5), float(jnp.max(jnp.abs(G - G_ref)))

    # also exercise the module-equivalent single-sample entry point
    H0, G0 = preprocess_forward(A[0], Q[0], W_i, W_u, W_g, b_i, b_u, b_g)
    jax.block_until_ready((H0, G0))
    assert jnp.allclose(H0, H_ref[0], atol=2e-5, rtol=2e-5)
    assert jnp.allclose(G0, G_ref[0], atol=2e-5, rtol=2e-5)

    print("KERNEL_OK")
</pallas_src>

<mosaic_0001>
module attributes {stable_mosaic.version = 11 : i64} {
  func.func @_preprocess_kernel(%arg0: i32, %arg1: memref<1x128x128xf32, #tpu.memory_space<vmem>>, %arg2: memref<1x128x128xf32, #tpu.memory_space<vmem>>, %arg3: memref<128x128xf32, #tpu.memory_space<vmem>>, %arg4: memref<128x128xf32, #tpu.memory_space<vmem>>, %arg5: memref<128x128xf32, #tpu.memory_space<vmem>>, %arg6: memref<1x128xf32, #tpu.memory_space<vmem>>, %arg7: memref<1x128xf32, #tpu.memory_space<vmem>>, %arg8: memref<128x1xf32, #tpu.memory_space<vmem>>, %arg9: memref<1x128x128xf32, #tpu.memory_space<vmem>>, %arg10: memref<1x128x128xf32, #tpu.memory_space<vmem>>) attributes {dimension_semantics = [#tpu.dimension_semantics<parallel>], iteration_bounds = array<i64: 4>, scalar_prefetch = 0 : i64, scratch_operands = 0 : i64, tpu.core_type = #tpu.core_type<tc>, window_params = [{transform_indices = @transform_0, window_bounds = array<i64: 1, 128, 128>}, {transform_indices = @transform_1, window_bounds = array<i64: 1, 128, 128>}, {pipeline_mode = #tpu.pipeline_mode<synchronous>, transform_indices = @transform_2, window_bounds = array<i64: 128, 128>}, {pipeline_mode = #tpu.pipeline_mode<synchronous>, transform_indices = @transform_3, window_bounds = array<i64: 128, 128>}, {pipeline_mode = #tpu.pipeline_mode<synchronous>, transform_indices = @transform_4, window_bounds = array<i64: 128, 128>}, {pipeline_mode = #tpu.pipeline_mode<synchronous>, transform_indices = @transform_5, window_bounds = array<i64: 1, 128>}, {pipeline_mode = #tpu.pipeline_mode<synchronous>, transform_indices = @transform_6, window_bounds = array<i64: 1, 128>}, {pipeline_mode = #tpu.pipeline_mode<synchronous>, transform_indices = @transform_7, window_bounds = array<i64: 128, 1>}, {transform_indices = @transform_8, window_bounds = array<i64: 1, 128, 128>}, {transform_indices = @transform_9, window_bounds = array<i64: 1, 128, 128>}]} {
    %c0 = arith.constant 0 : index
    %c0_0 = arith.constant 0 : index
    %c0_1 = arith.constant 0 : index
    %0 = vector.load %arg1[%c0, %c0_0, %c0_1] : memref<1x128x128xf32, #tpu.memory_space<vmem>>, vector<1x128x128xf32>
    %1 = vector.shape_cast %0 : vector<1x128x128xf32> to vector<128x128xf32>
    %c0_2 = arith.constant 0 : index
    %c0_3 = arith.constant 0 : index
    %c0_4 = arith.constant 0 : index
    %2 = vector.load %arg2[%c0_2, %c0_3, %c0_4] : memref<1x128x128xf32, #tpu.memory_space<vmem>>, vector<1x128x128xf32>
    %3 = vector.shape_cast %2 : vector<1x128x128xf32> to vector<128x128xf32>
    %c0_5 = arith.constant 0 : index
    %c0_6 = arith.constant 0 : index
    %4 = vector.load %arg3[%c0_5, %c0_6] : memref<128x128xf32, #tpu.memory_space<vmem>>, vector<128x128xf32>
    %c0_7 = arith.constant 0 : index
    %c0_8 = arith.constant 0 : index
    %5 = vector.load %arg4[%c0_7, %c0_8] : memref<128x128xf32, #tpu.memory_space<vmem>>, vector<128x128xf32>
    %c0_9 = arith.constant 0 : index
    %c0_10 = arith.constant 0 : index
    %6 = vector.load %arg5[%c0_9, %c0_10] : memref<128x128xf32, #tpu.memory_space<vmem>>, vector<128x128xf32>
    %c0_11 = arith.constant 0 : index
    %c0_12 = arith.constant 0 : index
    %7 = vector.load %arg6[%c0_11, %c0_12] : memref<1x128xf32, #tpu.memory_space<vmem>>, vector<1x128xf32>
    %c0_13 = arith.constant 0 : index
    %c0_14 = arith.constant 0 : index
    %8 = vector.load %arg7[%c0_13, %c0_14] : memref<1x128xf32, #tpu.memory_space<vmem>>, vector<1x128xf32>
    %c0_15 = arith.constant 0 : index
    %c0_16 = arith.constant 0 : index
    %9 = vector.load %arg8[%c0_15, %c0_16] : memref<128x1xf32, #tpu.memory_space<vmem>>, vector<128x1xf32>
    %cst = arith.constant dense<0.000000e+00> : vector<128x128xf32>
    %10 = tpu.matmul %4, %1, %cst {dimension_numbers = #tpu.dot_dimension_numbers<[1], [0], [0], [1], [0, 0, 1, 1], [], []>} : vector<128x128xf32>, vector<128x128xf32>, vector<128x128xf32> -> vector<128x128xf32>
    %cst_17 = arith.constant dense<0.000000e+00> : vector<128x128xf32>
    %11 = tpu.matmul %5, %1, %cst_17 {dimension_numbers = #tpu.dot_dimension_numbers<[1], [0], [0], [1], [0, 0, 1, 1], [], []>} : vector<128x128xf32>, vector<128x128xf32>, vector<128x128xf32> -> vector<128x128xf32>
    %cst_18 = arith.constant dense<0.000000e+00> : vector<128x128xf32>
    %12 = tpu.matmul %4, %3, %cst_18 {dimension_numbers = #tpu.dot_dimension_numbers<[1], [0], [0], [1], [0, 0, 1, 1], [], []>} : vector<128x128xf32>, vector<128x128xf32>, vector<128x128xf32> -> vector<128x128xf32>
    %13 = vector.broadcast %7 : vector<1x128xf32> to vector<128x128xf32>
    %14 = arith.addf %10, %13 : vector<128x128xf32>
    %15 = arith.negf %14 : vector<128x128xf32>
    %16 = math.exp %15 : vector<128x128xf32>
    %cst_19 = arith.constant 1.000000e+00 : f32
    %17 = vector.broadcast %cst_19 : f32 to vector<128x128xf32>
    %18 = arith.addf %17, %16 : vector<128x128xf32>
    %19 = arith.divf %17, %18 : vector<128x128xf32>
    %20 = vector.broadcast %8 : vector<1x128xf32> to vector<128x128xf32>
    %21 = arith.addf %11, %20 : vector<128x128xf32>
    %22 = math.tanh %21 : vector<128x128xf32>
    %23 = vector.broadcast %7 : vector<1x128xf32> to vector<128x128xf32>
    %24 = arith.addf %12, %23 : vector<128x128xf32>
    %25 = arith.negf %24 : vector<128x128xf32>
    %26 = math.exp %25 : vector<128x128xf32>
    %cst_20 = arith.constant 1.000000e+00 : f32
    %27 = vector.broadcast %cst_20 : f32 to vector<128x128xf32>
    %28 = arith.addf %27, %26 : vector<128x128xf32>
    %29 = arith.divf %27, %28 : vector<128x128xf32>
    %30 = vector.broadcast %8 : vector<1x128xf32> to vector<128x128xf32>
    %31 = arith.addf %12, %30 : vector<128x128xf32>
    %32 = arith.negf %31 : vector<128x128xf32>
    %33 = math.exp %32 : vector<128x128xf32>
    %cst_21 = arith.constant 1.000000e+00 : f32
    %34 = vector.broadcast %cst_21 : f32 to vector<128x128xf32>
    %35 = arith.addf %34, %33 : vector<128x128xf32>
    %36 = arith.divf %34, %35 : vector<128x128xf32>
    %37 = arith.mulf %19, %22 : vector<128x128xf32>
    %38 = arith.mulf %29, %36 : vector<128x128xf32>
    %cst_22 = arith.constant dense<0.000000e+00> : vector<128x128xf32>
    %39 = tpu.matmul %38, %6, %cst_22 {dimension_numbers = #tpu.dot_dimension_numbers<[0], [1], [1], [0], [0, 1, 1, 0], [], []>} : vector<128x128xf32>, vector<128x128xf32>, vector<128x128xf32> -> vector<128x128xf32>
    %40 = vector.broadcast %9 : vector<128x1xf32> to vector<128x128xf32>
    %41 = arith.addf %39, %40 : vector<128x128xf32>
    %42 = arith.mulf %41, %37 : vector<128x128xf32>
    %cst_23 = arith.constant dense<0xFF800000> : vector<128xf32>
    %43 = vector.multi_reduction <maximumf>, %42, %cst_23 [1] : vector<128x128xf32> to vector<128xf32>
    %44 = vector.shape_cast %43 : vector<128xf32> to vector<128x1xf32>
    %45 = vector.broadcast %44 : vector<128x1xf32> to vector<128x128xf32>
    %46 = arith.subf %42, %45 : vector<128x128xf32>
    %47 = math.exp %46 : vector<128x128xf32>
    %cst_24 = arith.constant dense<0.000000e+00> : vector<128xf32>
    %48 = vector.multi_reduction <add>, %47, %cst_24 [1] : vector<128x128xf32> to vector<128xf32>
    %49 = vector.shape_cast %48 : vector<128xf32> to vector<128x1xf32>
    %50 = tpu.reciprocal %49 : vector<128x1xf32> -> vector<128x1xf32>
    %51 = vector.broadcast %50 : vector<128x1xf32> to vector<128x128xf32>
    %52 = arith.mulf %47, %51 : vector<128x128xf32>
    %c0_25 = arith.constant 0 : index
    %c0_26 = arith.constant 0 : index
    %c0_27 = arith.constant 0 : index
    %53 = vector.load %arg10[%c0_25, %c0_26, %c0_27] : memref<1x128x128xf32, #tpu.memory_space<vmem>>, vector<1x128x128xf32>
    %54 = vector.shape_cast %53 : vector<1x128x128xf32> to vector<128x128xf32>
    %55 = vector.shape_cast %52 : vector<128x128xf32> to vector<1x128x128xf32>
    tpu.vector_store %arg10[%c0_25, %c0_26, %c0_27], %55 {strides = array<i32>} : memref<1x128x128xf32, #tpu.memory_space<vmem>>, vector<1x128x128xf32>,
    %56 = arith.mulf %38, %52 : vector<128x128xf32>
    %c0_28 = arith.constant 0 : index
    %c0_29 = arith.constant 0 : index
    %c0_30 = arith.constant 0 : index
    %57 = vector.load %arg9[%c0_28, %c0_29, %c0_30] : memref<1x128x128xf32, #tpu.memory_space<vmem>>, vector<1x128x128xf32>
    %58 = vector.shape_cast %57 : vector<1x128x128xf32> to vector<128x128xf32>
    %59 = vector.shape_cast %56 : vector<128x128xf32> to vector<1x128x128xf32>
    tpu.vector_store %arg9[%c0_28, %c0_29, %c0_30], %59 {strides = array<i32>} : memref<1x128x128xf32, #tpu.memory_space<vmem>>, vector<1x128x128xf32>,
    return
  }
  func.func @transform_0(%arg0: i32) -> (i32, i32, i32) {
    %c0_i32 = arith.constant 0 : i32
    %c0_i32_0 = arith.constant 0 : i32
    %c0_i32_1 = arith.constant 0 : i32
    return %arg0, %c0_i32, %c0_i32_0 : i32, i32, i32
  }
  func.func @transform_1(%arg0: i32) -> (i32, i32, i32) {
    %c0_i32 = arith.constant 0 : i32
    %c0_i32_0 = arith.constant 0 : i32
    %c0_i32_1 = arith.constant 0 : i32
    return %arg0, %c0_i32, %c0_i32_0 : i32, i32, i32
  }
  func.func @transform_2(%arg0: i32) -> (i32, i32) {
    %c0_i32 = arith.constant 0 : i32
    %c0_i32_0 = arith.constant 0 : i32
    %c0_i32_1 = arith.constant 0 : i32
    return %c0_i32, %c0_i32_0 : i32, i32
  }
  func.func @transform_3(%arg0: i32) -> (i32, i32) {
    %c0_i32 = arith.constant 0 : i32
    %c0_i32_0 = arith.constant 0 : i32
    %c0_i32_1 = arith.constant 0 : i32
    return %c0_i32, %c0_i32_0 : i32, i32
  }
  func.func @transform_4(%arg0: i32) -> (i32, i32) {
    %c0_i32 = arith.constant 0 : i32
    %c0_i32_0 = arith.constant 0 : i32
    %c0_i32_1 = arith.constant 0 : i32
    return %c0_i32, %c0_i32_0 : i32, i32
  }
  func.func @transform_5(%arg0: i32) -> (i32, i32) {
    %c0_i32 = arith.constant 0 : i32
    %c0_i32_0 = arith.constant 0 : i32
    %c0_i32_1 = arith.constant 0 : i32
    return %c0_i32, %c0_i32_0 : i32, i32
  }
  func.func @transform_6(%arg0: i32) -> (i32, i32) {
    %c0_i32 = arith.constant 0 : i32
    %c0_i32_0 = arith.constant 0 : i32
    %c0_i32_1 = arith.constant 0 : i32
    return %c0_i32, %c0_i32_0 : i32, i32
  }
  func.func @transform_7(%arg0: i32) -> (i32, i32) {
    %c0_i32 = arith.constant 0 : i32
    %c0_i32_0 = arith.constant 0 : i32
    %c0_i32_1 = arith.constant 0 : i32
    return %c0_i32, %c0_i32_0 : i32, i32
  }
  func.func @transform_8(%arg0: i32) -> (i32, i32, i32) {
    %c0_i32 = arith.constant 0 : i32
    %c0_i32_0 = arith.constant 0 : i32
    %c0_i32_1 = arith.constant 0 : i32
    return %arg0, %c0_i32, %c0_i32_0 : i32, i32, i32
  }
  func.func @transform_9(%arg0: i32) -> (i32, i32, i32) {
    %c0_i32 = arith.constant 0 : i32
    %c0_i32_0 = arith.constant 0 : i32
    %c0_i32_1 = arith.constant 0 : i32
    return %arg0, %c0_i32, %c0_i32_0 : i32, i32, i32
  }
}

</mosaic_0001>

<bundles_post_ra>
// kernel: preprocess_forward_batched.1
= control target key start
LH: loop header
LB: loop body
LE: loop exit
PB: predicated region body
PF: predicated region fallthrough
CT: control target
= control target key end

     0   :  { %s4124_s0 = inlined_call_operand.hbm [shape: f32[4,128,128], index: 0, kind: input, shape index: {}]   ;;  %s4125_s1 = inlined_call_operand.hbm [shape: f32[4,128,128], index: 1, kind: input, shape index: {}]   ;;  %s4126_s2 = inlined_call_operand.vmem [shape: f32[128,128], index: 2, kind: input, shape index: {}]   ;;  %s4127_s3 = inlined_call_operand.hbm [shape: f32[128,128], index: 3, kind: input, shape index: {}]   ;;  %s4128_s4 = inlined_call_operand.hbm [shape: f32[128,128], index: 4, kind: input, shape index: {}]   ;;  %s4129_s5 = inlined_call_operand.vmem [shape: f32[1,128], index: 5, kind: input, shape index: {}]   ;;  %s4130_s6 = inlined_call_operand.vmem [shape: f32[1,128], index: 6, kind: input, shape index: {}]   ;;  %s4131_s7 = inlined_call_operand.vmem [shape: f32[128,1], index: 7, kind: input, shape index: {}]   ;;  %s4132_s8 = inlined_call_operand.hbm [shape: f32[4,128,128], index: 8, kind: output, shape index: {0}]   ;;  %s4133_s9 = inlined_call_operand.hbm [shape: f32[4,128,128], index: 9, kind: output, shape index: {1}]  }
   0x1   :  { %4143 = sst [smem:[#allocation22_spill]] %s4124_s0 }
   0x2   :  { %4144 = sst [smem:[#allocation23_spill]] %s4127_s3 }
   0x3   :  { %4145 = sst [smem:[#allocation24_spill]] %s4128_s4 }
   0x4   :  { %15 = vsyncpa [#allocation3], 0 }
   0x5   :  { %17 = vsyncpa [#allocation3 + $0x1], 0 }
   0x6   :  { %18 = vsyncpa [#allocation6], 0 }
   0x7   :  { %20 = vsyncpa [#allocation6 + $0x1], 0 }
   0x8   :  { %21 = vsyncpa [#allocation9], 0 }
   0x9   :  { %22 = vsyncpa [#allocation4], 0 }
   0xa   :  { %24 = vsyncpa [#allocation4 + $0x1], 0 }
   0xb   :  { %25 = vsyncpa [#allocation12], 0 }
   0xc   :  { %27 = vsyncpa [#allocation12 + $0x1], 0  ;;  %s3213_s30 = smov 0   ;;  %s3215_s10 = smov 0  }
   0xd   :  { %s3217_s11 = smov 0   ;;  %s3219_s12 = smov 0  }
   0xe LB: > { %4146 = sst [smem:[#allocation19_spill]] %s3146_s11  ;;  %s3234_s13 = sadd.s32 4294967295, %s3150_s12   ;;  %s3150_s12 = sphi %s3219_s12, %s4173_s12   ;;  %s3146_s11 = sphi %s3217_s11, %s4170_s11   ;;  %s3142_s10 = sphi %s3215_s10, %s4172_s10   ;;  %s3138_s30 = sphi %s3213_s30, %s4171_s30  }
   0xf   : > { %s1991_s14 = sadd.s32 4294967294, %s3150_s12   ;;  %p53_p0 = scmp.ne.s32.totalorder %s3142_s10, %s3138_s30 }
  0x10   : > { %p4134_p1 = scmp.eq.s32.totalorder %s3234_s13, 0  ;;  %p235_p3 = scmp.eq.s32.totalorder %s1991_s14, 3 }
  0x11   : > { %p1992_p5 = scmp.ge.s32.totalorder %s3150_s12, 1  ;;  %p268_p7 = scmp.lt.s32.totalorder %s3150_s12, 5 }
  0x12   : > { %p3243_p4 = por %p4134_p1, %p53_p0  ;;  %p3248_p6 = por %p235_p3, %p53_p0 }
  0x13   : > { %p3253_p8 = pnand %p1992_p5, %p268_p7  ;;  %s3152_s18 = smov [#allocation7]  }
  0x14   : > { %s4147_s15 = scalar_select %p3243_p4, 1, 0 }
  0x15   : > { %s4148_s16 = scalar_select %p3248_p6, 1, 0 }
  0x16   : > { %s4150_s17 = scalar_select %p3253_p8, 1, 0 }
  0x17   : > { %4149 = sst [smem:[#allocation20_spill]] %s4148_s16  ;;  %s283_s19 = sshll.u32 %s3152_s18, 4  ;;  %s284_s19 = int_to_ptr.vmem [resolvable:$true] %s283_s19 }
  0x18   : > { %p2567_p9 = pneg %p3253_p8  ;;  %s3153_s21 = smov [#allocation8]  }
  0x19   : > { %s296_s22 = sshll.u32 %s3153_s21, 4  ;;  %s4152_s3 = sld [smem:[#allocation23_spill]]  ;;  %s3265_s22 = int_to_ptr.vmem [resolvable:$true] %s296_s22 }
  0x1a   : > { %p3261_p10 = pnand %p2567_p9, %p4134_p1 }
  0x1c   : > { %p2926_p12 = pneg %p3261_p10 }
  0x1f   : > { %s2924_s25 = scalar_lea.hbm %s4152_s3, 2048 }
  0x20   : > { %p2925_p11 = scmp.ne.s32.totalorder %s4152_s3, %s2924_s25  ;;  %p2931_p3 = scmp.lt.u32.totalorder %s2924_s25, %s4152_s3 }
  0x22   : > { %p2927_p13 = pnand %p2926_p12, %p2925_p11 }
  0x24   : > { %p2928_p0 = pneg %p2927_p13 }
  0x26   : > { %p2933_p5 = pnand %p2931_p3, %p2928_p0 }
  0x28   : > { %2936 = shalt.err (!%p2933_p5)
}
  0x29   : > { %s2937_s14 = scalar_lea.vmem %s284_s19, 2048  ;;  %p2945_p2 = scmp.lt.s32.totalorder %s284_s19, %s284_s19 }
  0x2a   : > { %p2938_p7 = scmp.ne.s32.totalorder %s284_s19, %s2937_s14  ;;  %p2946_p6 = scmp.lt.s32.totalorder %s2937_s14, %s2937_s14 }
  0x2c   : > { %p2940_p9 = pnand %p2938_p7, %p2926_p12  ;;  %p2947_p4 = por %p2946_p6, %p2945_p2 }
  0x2e   : > { %p2941_p1 = pneg %p2940_p9 }
  0x30   : > { %p2948_p8 = pnand %p2947_p4, %p2941_p1 }
  0x32   : > { %2951 = shalt.err (!%p2948_p8)
}
  0x33   : > { %s4138_s18 = smov 128   ;;  %s4140_s21 = smov 8  }
  0x34   : > { %2570 = dma.hbm_to_vmem [thread:$0]  (!%p3261_p10), %s4152_s3, 2048, %s284_s19, [#allocation6], %s4138_s18, %s4138_s18, %s4140_s21  }
  0x35   : > { %s4153_s4 = sld [smem:[#allocation24_spill]] }
  0x3b   : > { %s2952_s27 = scalar_lea.hbm %s4153_s4, 2048 }
  0x3c   : > { %p2953_p1 = scmp.ne.s32.totalorder %s4153_s4, %s2952_s27  ;;  %p2959_p6 = scmp.lt.u32.totalorder %s2952_s27, %s4153_s4 }
  0x3e   : > { %p2955_p2 = pnand %p2953_p1, %p2926_p12 }
  0x40   : > { %p2956_p4 = pneg %p2955_p2 }
  0x42   : > { %p2961_p8 = pnand %p2959_p6, %p2956_p4 }
  0x44   : > { %2964 = shalt.err (!%p2961_p8)
}
  0x45   : > { %s2965_s19 = scalar_lea.vmem %s3265_s22, 2048  ;;  %p2973_p3 = scmp.lt.s32.totalorder %s3265_s22, %s3265_s22 }
  0x46   : > { %p2966_p11 = scmp.ne.s32.totalorder %s3265_s22, %s2965_s19  ;;  %p2974_p5 = scmp.lt.s32.totalorder %s2965_s19, %s2965_s19 }
  0x48   : > { %p2968_p13 = pnand %p2966_p11, %p2926_p12  ;;  %p2975_p7 = por %p2974_p5, %p2973_p3 }
  0x4a   : > { %p2969_p0 = pneg %p2968_p13 }
  0x4c   : > { %p2976_p9 = pnand %p2975_p7, %p2969_p0 }
  0x4e   : > { %2979 = shalt.err (!%p2976_p9)
}
  0x4f   : > { %2573 = dma.hbm_to_vmem [thread:$0]  (!%p3261_p10), %s4153_s4, 2048, %s3265_s22, [#allocation9], %s4138_s18, %s4138_s18, %s4140_s21  }
  0x50   : > { %s3321_s20 = sadd.s32 1, %s3150_s12   ;;  %s40_s24 = sadd.s32 1, %s3146_s11 }
  0x51   : > { %s37_s25 = ssub.s32 %s3150_s12, %s3321_s20  ;;  %p47_p12 = scmp.ne.s32.totalorder %s3146_s11, %s3142_s10 }
  0x52   : > { %p38_p1 = scmp.eq.s32.totalorder %s37_s25, 0  ;;  %p48_p2 = scmp.eq.s32.totalorder %s3150_s12, 0 }
  0x53   : > { %p4154_p4 = scmp.eq.s32.totalorder %s3234_s13, 3  ;;  %p2590_p8 = scmp.lt.s32.totalorder %s3150_s12, 4 }
  0x54   : > { %s3337_s27 = scalar_select %p38_p1, %s3146_s11, %s40_s24  }
  0x55   : > { %p3331_p6 = por %p4154_p4, %p47_p12  ;;  %p49_p11 = por %p48_p2, %p47_p12 }
  0x56   : > { %4156 = sst [smem:[#allocation21_spill]] %s3337_s27  ;;  %s319_s28 = sand.u32 1, %s3146_s11  }
  0x57   : > { %s1996_s29 = sshll.u32 %s319_s28, 7  ;;  %s2067_s22 = sshll.u32 %s3150_s12, 11 }
  0x58   : > { %s4157_s0 = sld [smem:[#allocation22_spill]]  ;;  %s323_s23 = scalar_lea.vmem [#allocation2], %s1996_s29 }
  0x59   : > { %s330_s25 = sshll.u32 %s323_s23, 4  ;;  %p3348_p10 = pnand %p2590_p8, %p49_p11  ;;  %s3346_s25 = int_to_ptr.vmem [resolvable:$true] %s330_s25 }
  0x5a   : > { %s3355_s14 = scalar_lea.hbm %s4125_s1, %s2067_s22  ;;  %s344_s19 = scalar_lea.vmem [#allocation5], %s1996_s29 }
  0x5b   : > { %s3357_s3 = sshll.u32 %s344_s19, 4  ;;  %s3359_s4 = scalar_lea.sflag [#allocation3], %s319_s28  ;;  %s3391_s3 = int_to_ptr.vmem [resolvable:$true] %s3357_s3 }
  0x5c   : > { %p2982_p0 = pneg %p3348_p10 }
  0x5e   : > { %s3344_s16 = scalar_lea.hbm %s4157_s0, %s2067_s22  ;;  %s2985_s18 = scalar_lea.hbm %s4157_s0, 8192 }
  0x5f   : > { %s2980_s23 = scalar_lea.hbm %s3344_s16, 2048  ;;  %p2986_p7 = scmp.lt.u32.totalorder %s3344_s16, %s4157_s0 }
  0x60   : > { %p2981_p13 = scmp.ne.s32.totalorder %s3344_s16, %s2980_s23  ;;  %p2987_p9 = scmp.lt.u32.totalorder %s2985_s18, %s2980_s23 }
  0x61   : > { %p2989_p1 = scmp.lt.u32.totalorder %s2980_s23, %s3344_s16 }
  0x62   : > { %p2983_p3 = pnand %p2982_p0, %p2981_p13  ;;  %p2988_p12 = por %p2987_p9, %p2986_p7 }
  0x64   : > { %p2984_p5 = pneg %p2983_p3  ;;  %p2990_p2 = por %p2989_p1, %p2988_p12 }
  0x66   : > { %p2991_p4 = pnand %p2990_p2, %p2984_p5 }
  0x68   : > { %2994 = shalt.err (!%p2991_p4)
}
  0x69   : > { %s2995_s28 = scalar_lea.vmem %s3346_s25, 2048  ;;  %s3156_s11 = smov [#allocation2]  }
  0x6a   : > { %p2996_p8 = scmp.ne.s32.totalorder %s3346_s25, %s2995_s28  ;;  %s3000_s27 = sshll.u32 %s3156_s11, 4  ;;  %s3001_s27 = int_to_ptr.vmem [resolvable:$false] %s3000_s27 }
  0x6b   : > { %s3002_s29 = scalar_lea.vmem %s3001_s27, 4096  ;;  %p3003_p3 = scmp.lt.s32.totalorder %s3346_s25, %s3001_s27 }
  0x6c   : > { %p2998_p11 = pnand %p2996_p8, %p2982_p0  ;;  %p3004_p7 = scmp.lt.s32.totalorder %s3002_s29, %s2995_s28 }
  0x6e   : > { %p2999_p13 = pneg %p2998_p11  ;;  %p3005_p9 = por %p3004_p7, %p3003_p3 }
  0x70   : > { %p3006_p12 = pnand %p3005_p9, %p2999_p13 }
  0x72   : > { %3009 = shalt.err (!%p3006_p12)
}
  0x73   : > { %s4159_s19 = smov 8   ;;  %s4160_s23 = smov 128  }
  0x74   : > { %2577 = dma.hbm_to_vmem [thread:$0]  (!%p3348_p10), %s3344_s16, 2048, %s3346_s25, %s3359_s4, %s4160_s23, %s4160_s23, %s4159_s19  }
  0x75   : > { %s340_s18 = sand.u32 1, %s3150_s12   ;;  %s3010_s22 = scalar_lea.hbm %s3355_s14, 2048 }
  0x76   : > { %s3394_s21 = scalar_lea.sflag [#allocation6], %s340_s18  ;;  %p3011_p5 = scmp.ne.s32.totalorder %s3355_s14, %s3010_s22 }
  0x77   : > { %s3015_s27 = scalar_lea.hbm %s4125_s1, 8192  ;;  %p3016_p4 = scmp.lt.u32.totalorder %s3355_s14, %s4125_s1 }
  0x78   : > { %p3013_p1 = pnand %p3011_p5, %p2982_p0  ;;  %p3017_p8 = scmp.lt.u32.totalorder %s3015_s27, %s3010_s22 }
  0x79   : > { %p3019_p13 = scmp.lt.u32.totalorder %s3010_s22, %s3355_s14 }
  0x7a   : > { %p3014_p2 = pneg %p3013_p1  ;;  %p3018_p11 = por %p3017_p8, %p3016_p4 }
  0x7c   : > { %p3020_p3 = por %p3019_p13, %p3018_p11 }
  0x7e   : > { %p3021_p7 = pnand %p3020_p3, %p3014_p2 }
  0x80   : > { %3024 = shalt.err (!%p3021_p7)
}
  0x81   : > { %s3025_s4 = scalar_lea.vmem %s3391_s3, 2048  ;;  %s3157_s16 = smov [#allocation5]  }
  0x82   : > { %p3026_p9 = scmp.ne.s32.totalorder %s3391_s3, %s3025_s4  ;;  %s3030_s25 = sshll.u32 %s3157_s16, 4  ;;  %s3031_s25 = int_to_ptr.vmem [resolvable:$false] %s3030_s25 }
  0x83   : > { %s3032_s0 = scalar_lea.vmem %s3031_s25, 4096  ;;  %p3033_p1 = scmp.lt.s32.totalorder %s3391_s3, %s3031_s25 }
  0x84   : > { %p3028_p12 = pnand %p3026_p9, %p2982_p0  ;;  %p3034_p4 = scmp.lt.s32.totalorder %s3032_s0, %s3025_s4 }
  0x86   : > { %p3029_p5 = pneg %p3028_p12  ;;  %p3035_p8 = por %p3034_p4, %p3033_p1 }
  0x88   : > { %p3036_p11 = pnand %p3035_p8, %p3029_p5 }
  0x8a   : > { %3039 = shalt.err (!%p3036_p11)
}
  0x8b   : > { %2580 = dma.hbm_to_vmem [thread:$0]  (!%p3348_p10), %s3355_s14, 2048, %s3391_s3, %s3394_s21, %s4160_s23, %s4160_s23, %s4159_s19  }
  0x8c   : > { %p4161_p0 = scmp.ne.s32.totalorder %s4150_s17, 0 }
  0x8d   : > { %s3426_s18 = sand.u32 (!%p4161_p0), 1, %s3142_s10   ;;  %p4162_p2 = scmp.ne.s32.totalorder (!%p4161_p0), %s4147_s15, 0 }
  0x8e   : > { %363 = sbr.rel (%p4161_p0) target bundleno = 1198 (0x4ae), region = 52  ;;  %s3429_s22 = sshll.u32 (!%p4161_p0), %s3426_s18, 7 }
  0x8f   : > { %s366_s24 = scalar_lea.sflag (!%p4161_p0), [#allocation3], %s3426_s18  ;;  %s3433_s28 = scalar_lea.vmem (!%p4161_p0), [#allocation2], %s3429_s22 }
  0x95   : > { %3113 = dma.done.wait (%p4162_p2), %s366_s24, 2048  }
  0x96   : > { %3115 = vsyncadd (%p4162_p2), %s366_s24, 4294965248  ;;  %s374_s3 = sand.u32 1, %s3234_s13   ;;  %s3441_s14 = scalar_lea.vmem [#allocation5], %s3429_s22 }
  0x97   : > { %s375_s17 = scalar_lea.sflag [#allocation6], %s374_s3 }
  0x98   : > { %3117 = dma.done.wait (%p4162_p2), %s375_s17, 2048  }
  0x99   : > { %3119 = vsyncadd (%p4162_p2), %s375_s17, 4294965248  ;;  %p4163_p10 = scmp.eq.s32.totalorder %s3234_s13, 0 }
  0x9b   : > { %3121 = dma.done.wait (%p4163_p10), [#allocation6], 2048   ;;  %p4164_p13 = pmov %p4163_p10 }
  0x9c   : > { %p4165_p3 = pmov %p4163_p10 }
  0x9d   : > { %3123 = vsyncadd (%p4164_p13), [#allocation6], 4294965248 }
  0x9e   : > { %3125 = dma.done.wait (%p4165_p3), [#allocation9], 2048   ;;  %p4166_p7 = pmov %p4165_p3 }
  0x9f   : > { %v447_v0 = vld [vmem:[%s3441_s14] sm:$0xff]  ;;  %v448_v1 = vld [vmem:[%s3441_s14 + $0x8] sm:$0xff]  ;;  %v449_v2 = vld [vmem:[%s3441_s14 + $0x10] sm:$0xff]  ;;  %s3969_s4 = scalar_lea.vmem [#allocation11], %s3429_s22  ;;  %s3976_s16 = scalar_lea.vmem [#allocation10], %s3429_s22 }
  0xa0   : > { %3127 = vsyncadd (%p4166_p7), [#allocation9], 4294965248  ;;  %v2423_v3 = vpack.c.bf16 %v448_v1, %v447_v0  ;;  %v450_v4 = vld [vmem:[%s3441_s14 + $0x18] sm:$0xff]  ;;  %v451_v6 = vld [vmem:[%s3441_s14 + $0x20] sm:$0xff]  ;;  %s2069_s22 = sshll.u32 %s3234_s13, 11  ;;  %s1844_s25 = sshll.u32 %s3969_s4, 4  ;;  %s4038_s25 = int_to_ptr.vmem [resolvable:$true] %s1844_s25 }
  0xa1   : > { %v2427_v5 = vpack.c.bf16 %v450_v4, %v449_v2  ;;  %v452_v7 = vld [vmem:[%s3441_s14 + $0x28] sm:$0xff]  ;;  %v463_v9 = vld [vmem:[%s4126_s2] sm:$0xff]  ;;  %v453_v10 = vld [vmem:[%s3441_s14 + $0x30] sm:$0xff]  ;;  %s1828_s0 = sshll.u32 %s3976_s16, 4  ;;  %s4036_s17 = scalar_lea.hbm %s4133_s9, %s2069_s22  ;;  %s4049_s0 = int_to_ptr.vmem [resolvable:$true] %s1828_s0 }
  0xa2   : > { %2424 = vmatprep.subr.bf16.mxu0 %v2423_v3  ;;  %v2431_v8 = vpack.c.bf16 %v452_v7, %v451_v6  ;;  %v454_v11 = vld [vmem:[%s3441_s14 + $0x38] sm:$0xff]  ;;  %2231 = vmatprep.mubr.f32.mxu0 %v463_v9  ;;  %v455_v13 = vld [vmem:[%s3441_s14 + $0x40] sm:$0xff]  ;;  %v456_v14 = vld [vmem:[%s3441_s14 + $0x48] sm:$0xff]  ;;  %s4047_s15 = scalar_lea.hbm %s4132_s8, %s2069_s22  ;;  %s1815_s19 = scalar_lea.sflag [#allocation12], %s3426_s18 }
  0xa3   : > { %2426 = vmatpush3.bf16.msra.mxu0 %v2423_v3  ;;  %2287 = vmatprep.mubr.f32.mxu1 %v463_v9  ;;  %v2435_v12 = vpack.c.bf16 %v454_v11, %v453_v10  ;;  %v2439_v15 = vpack.c.bf16 %v456_v14, %v455_v13  ;;  %v457_v16 = vld [vmem:[%s3441_s14 + $0x50] sm:$0xff]  ;;  %v458_v17 = vld [vmem:[%s3441_s14 + $0x58] sm:$0xff]  ;;  %v459_v19 = vld [vmem:[%s3441_s14 + $0x60] sm:$0xff]  ;;  %s3159_s23 = smov [#allocation11]  }
  0xa4   : > { %2428 = vmatprep.subr.bf16.mxu0 %v2427_v5  ;;  %v2443_v18 = vpack.c.bf16 %v458_v17, %v457_v16  ;;  %v460_v20 = vld [vmem:[%s3441_s14 + $0x68] sm:$0xff]  ;;  %v461_v22 = vld [vmem:[%s3441_s14 + $0x70] sm:$0xff]  ;;  %v462_v23 = vld [vmem:[%s3441_s14 + $0x78] sm:$0xff]  ;;  %s3044_s21 = sshll.u32 %s3159_s23, 4  ;;  %s3045_s21 = int_to_ptr.vmem [resolvable:$false] %s3044_s21 }
  0xa5   : > { %v2447_v21 = vpack.c.bf16 %v460_v20, %v459_v19  ;;  %v2451_v24 = vpack.c.bf16 %v462_v23, %v461_v22  ;;  %v3477_v25 = vld [vmem:[%s4126_s2 + $0x8] sm:$0xff]  ;;  %v3482_v26 = vld [vmem:[%s4126_s2 + $0x10] sm:$0xff]  ;;  %v3489_v27 = vld [vmem:[%s4126_s2 + $0x18] sm:$0xff]  ;;  %s3046_s11 = scalar_lea.vmem %s3045_s21, 4096  ;;  %p3047_p1 = scmp.lt.s32.totalorder %s4038_s25, %s3045_s21 }
  0xa6   : > { %v3494_v28 = vld [vmem:[%s4126_s2 + $0x20] sm:$0xff]  ;;  %v3501_v29 = vld [vmem:[%s4126_s2 + $0x28] sm:$0xff]  ;;  %v3506_v30 = vld [vmem:[%s4126_s2 + $0x30] sm:$0xff] }
  0xa7   : > { %2430 = vmatpush3.bf16.msra.mxu0 %v2427_v5  ;;  %v3513_v31 = vld [vmem:[%s4126_s2 + $0x38] sm:$0xff]  ;;  %v3518_v32 = vld [vmem:[%s4126_s2 + $0x40] sm:$0xff]  ;;  %v3525_v33 = vld [vmem:[%s4126_s2 + $0x48] sm:$0xff] }
  0xa8   : > { %2432 = vmatprep.subr.bf16.mxu0 %v2431_v8  ;;  %v3530_v34 = vld [vmem:[%s4126_s2 + $0x50] sm:$0xff]  ;;  %v3537_v35 = vld [vmem:[%s4126_s2 + $0x58] sm:$0xff]  ;;  %v3542_v36 = vld [vmem:[%s4126_s2 + $0x60] sm:$0xff] }
  0xa9   : > { %v3549_v37 = vld [vmem:[%s4126_s2 + $0x68] sm:$0xff]  ;;  %v3554_v38 = vld [vmem:[%s4126_s2 + $0x70] sm:$0xff]  ;;  %v3561_v39 = vld [vmem:[%s4126_s2 + $0x78] sm:$0xff] }
  0xaa   : > { %v431_v40 = vld [vmem:[%s3433_s28] sm:$0xff]  ;;  %v432_v41 = vld [vmem:[%s3433_s28 + $0x8] sm:$0xff]  ;;  %v433_v43 = vld [vmem:[%s3433_s28 + $0x10] sm:$0xff] }
  0xab   : > { %2434 = vmatpush3.bf16.msra.mxu0 %v2431_v8  ;;  %v2455_v42 = vpack.c.bf16 %v432_v41, %v431_v40  ;;  %v434_v44 = vld [vmem:[%s3433_s28 + $0x18] sm:$0xff]  ;;  %v435_v46 = vld [vmem:[%s3433_s28 + $0x20] sm:$0xff]  ;;  %v436_v47 = vld [vmem:[%s3433_s28 + $0x28] sm:$0xff] }
  0xac   : > { %2436 = vmatprep.subr.bf16.mxu0 %v2435_v12  ;;  %v2459_v45 = vpack.c.bf16 %v434_v44, %v433_v43  ;;  %v2463_v48 = vpack.c.bf16 %v436_v47, %v435_v46  ;;  %v437_v49 = vld [vmem:[%s3433_s28 + $0x30] sm:$0xff]  ;;  %v438_v50 = vld [vmem:[%s3433_s28 + $0x38] sm:$0xff]  ;;  %v439_v52 = vld [vmem:[%s3433_s28 + $0x40] sm:$0xff] }
  0xad   : > { %2456 = vmatprep.subr.bf16.mxu1 %v2455_v42  ;;  %v2467_v51 = vpack.c.bf16 %v438_v50, %v437_v49  ;;  %v440_v53 = vld [vmem:[%s3433_s28 + $0x48] sm:$0xff]  ;;  %v441_v55 = vld [vmem:[%s3433_s28 + $0x50] sm:$0xff]  ;;  %v442_v56 = vld [vmem:[%s3433_s28 + $0x58] sm:$0xff] }
  0xae   : > { %2458 = vmatpush3.bf16.msra.mxu1 %v2455_v42  ;;  %v2471_v54 = vpack.c.bf16 %v440_v53, %v439_v52  ;;  %v2475_v57 = vpack.c.bf16 %v442_v56, %v441_v55  ;;  %v443_v58 = vld [vmem:[%s3433_s28 + $0x60] sm:$0xff]  ;;  %v444_v59 = vld [vmem:[%s3433_s28 + $0x68] sm:$0xff]  ;;  %v445_v61 = vld [vmem:[%s3433_s28 + $0x70] sm:$0xff] }
  0xaf   : > { %2438 = vmatpush3.bf16.msra.mxu0 %v2435_v12  ;;  %2460 = vmatprep.subr.bf16.mxu1 %v2459_v45  ;;  %v2479_v60 = vpack.c.bf16 %v444_v59, %v443_v58  ;;  %v446_v62 = vld [vmem:[%s3433_s28 + $0x78] sm:$0xff]  ;;  %v495_v0 = vld [vmem:[#allocation8] sm:$0xff]  ;;  %v496_v1 = vld [vmem:[#allocation8 + $0x8] sm:$0xff]  ;;  %s3040_s28 = scalar_lea.vmem %s4038_s25, 2048 }
  0xb0   : > { %2440 = vmatprep.subr.bf16.mxu0 %v2439_v15  ;;  %v2483_v63 = vpack.c.bf16 %v446_v62, %v445_v61  ;;  %v2519_v2 = vpack.c.bf16 %v496_v1, %v495_v0  ;;  %v479_v3 = vld [vmem:[#allocation7] sm:$0xff]  ;;  %v480_v4 = vld [vmem:[#allocation7 + $0x8] sm:$0xff]  ;;  %v497_v5 = vld [vmem:[#allocation8 + $0x10] sm:$0xff]  ;;  %p3041_p9 = scmp.ne.s32.totalorder %s4038_s25, %s3040_s28  ;;  %p3048_p4 = scmp.lt.s32.totalorder %s3046_s11, %s3040_s28 }
  0xb1   : > { %v498_v6 = vld [vmem:[#allocation8 + $0x18] sm:$0xff]  ;;  %v481_v7 = vld [vmem:[#allocation7 + $0x10] sm:$0xff]  ;;  %v499_v9 = vld [vmem:[#allocation8 + $0x20] sm:$0xff] }
  0xb2   : > { %2462 = vmatpush3.bf16.msra.mxu1 %v2459_v45  ;;  %v2523_v8 = vpack.c.bf16 %v498_v6, %v497_v5  ;;  %v500_v10 = vld [vmem:[#allocation8 + $0x28] sm:$0xff]  ;;  %v501_v12 = vld [vmem:[#allocation8 + $0x30] sm:$0xff]  ;;  %v502_v13 = vld [vmem:[#allocation8 + $0x38] sm:$0xff]  ;;  %p3042_p12 = pnand %p3041_p9, %p3331_p6  ;;  %p3049_p8 = por %p3048_p4, %p3047_p1 }
  0xb3   : > { %2442 = vmatpush3.bf16.msra.mxu0 %v2439_v15  ;;  %2464 = vmatprep.subr.bf16.mxu1 %v2463_v48  ;;  %v2527_v11 = vpack.c.bf16 %v500_v10, %v499_v9  ;;  %v2531_v14 = vpack.c.bf16 %v502_v13, %v501_v12  ;;  %v503_v15 = vld [vmem:[#allocation8 + $0x40] sm:$0xff]  ;;  %v504_v16 = vld [vmem:[#allocation8 + $0x48] sm:$0xff]  ;;  %v509_v10 = vld [vmem:[#allocation8 + $0x70] sm:$0xff] }
  0xb4   : > { %2444 = vmatprep.subr.bf16.mxu0 %v2443_v18  ;;  %v3596_v17 = vld [vmem:[%s4129_s5] ss:$0 sm:$0xff]  ;;  %v2535_v20 = vpack.c.bf16 %v504_v16, %v503_v15  ;;  %p3043_p5 = pneg %p3042_p12 }
  0xb5   : > { %v507_v53 = vld [vmem:[#allocation8 + $0x60] sm:$0xff] }
  0xb6   : > { %2466 = vmatpush3.bf16.msra.mxu1 %v2463_v48  ;;  %p3050_p11 = pnand %p3049_p8, %p3043_p5 }
  0xb7   : > { %2446 = vmatpush3.bf16.msra.mxu0 %v2443_v18  ;;  %2468 = vmatprep.subr.bf16.mxu1 %v2467_v51  ;;  %v3601_v18 = vld [vmem:[%s4130_s6] ss:$0 sm:$0xff] }
  0xb8   : > { %2448 = vmatprep.subr.bf16.mxu0 %v2447_v21 }
  0xba   : > { %2470 = vmatpush3.bf16.msra.mxu1 %v2467_v51 }
  0xbb   : > { %2450 = vmatpush3.bf16.msra.mxu0 %v2447_v21  ;;  %2472 = vmatprep.subr.bf16.mxu1 %v2471_v54 }
  0xbc   : > { %2452 = vmatprep.subr.bf16.mxu0 %v2451_v24 }
  0xbe   : > { %2474 = vmatpush3.bf16.msra.mxu1 %v2471_v54 }
  0xbf   : > { %2454 = vmatpush3.bf16.msra.mxu0 %v2451_v24  ;;  %2476 = vmatprep.subr.bf16.mxu1 %v2475_v57 }
  0xc0   : > { %2488 = vmatprep.subr.bf16.mxu0 %v2455_v42 }
  0xc2   : > { %2232 = vmatmul.mubr.f32.vlgmr.msra.gmra.mrb[0].mxu0 %v3477_v25  ;;  %2478 = vmatpush3.bf16.msra.mxu1 %v2475_v57 }
  0xc3   : > { %2234 = vmatprep.mubr.f32.mxu0 %v3482_v26  ;;  %2490 = vmatpush3.bf16.msra.mxu0 %v2455_v42 }
  0xc4   : > { %2492 = vmatprep.subr.bf16.mxu0 %v2459_v45  ;;  %2480 = vmatprep.subr.bf16.mxu1 %v2479_v60 }
  0xc6   : > { %2235 = vmatmul.mubr.f32.gmra.mrb[2].mxu0 %v3489_v27  ;;  %2482 = vmatpush3.bf16.msra.mxu1 %v2479_v60 }
  0xc7   : > { %2237 = vmatprep.mubr.f32.mxu0 %v3494_v28  ;;  %2494 = vmatpush3.bf16.msra.mxu0 %v2459_v45 }
  0xc8   : > { %2496 = vmatprep.subr.bf16.mxu0 %v2463_v48  ;;  %2484 = vmatprep.subr.bf16.mxu1 %v2483_v63 }
  0xca   : > { %2238 = vmatmul.mubr.f32.gmra.mrb[4].mxu0 %v3501_v29  ;;  %2486 = vmatpush3.bf16.msra.mxu1 %v2483_v63 }
  0xcb   : > { %2240 = vmatprep.mubr.f32.mxu0 %v3506_v30  ;;  %2498 = vmatpush3.bf16.msra.mxu0 %v2463_v48 }
  0xcc   : > { %2500 = vmatprep.subr.bf16.mxu0 %v2467_v51  ;;  %2520 = vmatprep.subr.bf16.mxu1 %v2519_v2 }
  0xcd   : > { %2288 = vmatmul.mubr.f32.vlgmr.msra.gmra.mrb[0].mxu1 %v3477_v25 }
  0xce   : > { %2241 = vmatmul.mubr.f32.gmra.mrb[6].mxu0 %v3513_v31  ;;  %2290 = vmatprep.mubr.f32.mxu1 %v3482_v26 }
  0xcf   : > { %2243 = vmatprep.mubr.f32.mxu0 %v3518_v32  ;;  %2502 = vmatpush3.bf16.msra.mxu0 %v2467_v51 }
  0xd0   : > { %2504 = vmatprep.subr.bf16.mxu0 %v2471_v54 }
  0xd1   : > { %2291 = vmatmul.mubr.f32.gmra.mrb[2].mxu1 %v3489_v27 }
  0xd2   : > { %2244 = vmatmul.mubr.f32.gmra.mrb[8].mxu0 %v3525_v33  ;;  %2293 = vmatprep.mubr.f32.mxu1 %v3494_v28 }
  0xd3   : > { %2246 = vmatprep.mubr.f32.mxu0 %v3530_v34  ;;  %2506 = vmatpush3.bf16.msra.mxu0 %v2471_v54  ;;  %v508_v54 = vld [vmem:[#allocation8 + $0x68] sm:$0xff] }
  0xd4   : > { %2508 = vmatprep.subr.bf16.mxu0 %v2475_v57  ;;  %2522 = vmatpush3.bf16.xpose.msra.mxu1 %v2519_v2 }
  0xd5   : > { %2524 = vmatprep.subr.bf16.mxu1 %v2523_v8  ;;  %2294 = vmatmul.mubr.f32.gmra.mrb[4].mxu1 %v3501_v29 }
  0xd6   : > { %2247 = vmatmul.mubr.f32.gmra.mrb[10].mxu0 %v3537_v35  ;;  %2296 = vmatprep.mubr.f32.mxu1 %v3506_v30 }
  0xd7   : > { %2249 = vmatprep.mubr.f32.mxu0 %v3542_v36  ;;  %2510 = vmatpush3.bf16.msra.mxu0 %v2475_v57 }
  0xd8   : > { %2512 = vmatprep.subr.bf16.mxu0 %v2479_v60 }
  0xd9   : > { %2297 = vmatmul.mubr.f32.gmra.mrb[6].mxu1 %v3513_v31 }
  0xda   : > { %2250 = vmatmul.mubr.f32.gmra.mrb[12].mxu0 %v3549_v37  ;;  %2299 = vmatprep.mubr.f32.mxu1 %v3518_v32 }
  0xdb   : > { %2252 = vmatprep.mubr.f32.mxu0 %v3554_v38  ;;  %2514 = vmatpush3.bf16.msra.mxu0 %v2479_v60  ;;  %v2543_v60 = vpack.c.bf16 %v508_v54, %v507_v53 }
  0xdc   : > { %2516 = vmatprep.subr.bf16.mxu0 %v2483_v63  ;;  %2526 = vmatpush3.bf16.xpose.msra.mxu1 %v2523_v8 }
  0xdd   : > { %2528 = vmatprep.subr.bf16.mxu1 %v2527_v11  ;;  %2300 = vmatmul.mubr.f32.gmra.mrb[8].mxu1 %v3525_v33 }
  0xde   : > { %2253 = vmatmul.mubr.f32.gmra.mrb[14].mxu0 %v3561_v39  ;;  %2302 = vmatprep.mubr.f32.mxu1 %v3530_v34  ;;  %v505_v34 = vld [vmem:[#allocation8 + $0x50] sm:$0xff] }
  0xdf   : > { %2518 = vmatpush3.bf16.msra.mxu0 %v2483_v63  ;;  %2343 = vmatprep.mubr.f32.mxu0 %v479_v3 }
  0xe1   : > { %2303 = vmatmul.mubr.f32.gmra.mrb[10].mxu1 %v3537_v35  ;;  %v506_v35 = vld [vmem:[#allocation8 + $0x58] sm:$0xff] }
  0xe2   : > { %2344 = vmatmul.mubr.f32.vlgmr.msra.gmra.mrb[16].mxu0 %v480_v4  ;;  %2305 = vmatprep.mubr.f32.mxu1 %v3542_v36  ;;  %v2539_v43 = vpack.c.bf16 %v506_v35, %v505_v34 }
  0xe3   : > { %2346 = vmatprep.mubr.f32.mxu0 %v481_v7 }
  0xe4   : > { %2530 = vmatpush3.bf16.xpose.msra.mxu1 %v2527_v11  ;;  %v510_v11 = vld [vmem:[#allocation8 + $0x78] sm:$0xff] }
  0xe5   : > { %2532 = vmatprep.subr.bf16.mxu1 %v2531_v14  ;;  %2306 = vmatmul.mubr.f32.gmra.mrb[12].mxu1 %v3549_v37 }
  0xe6   : > { %2308 = vmatprep.mubr.f32.mxu1 %v3554_v38 }
  0xe9   : > { %2309 = vmatmul.mubr.f32.gmra.mrb[14].mxu1 %v3561_v39 }
  0xec   : > { %2534 = vmatpush3.bf16.xpose.msra.mxu1 %v2531_v14 }
  0xed   : > { %2536 = vmatprep.subr.bf16.mxu1 %v2535_v20 }
  0xf4   : > { %2538 = vmatpush3.bf16.xpose.msra.mxu1 %v2535_v20 }
  0xf5   : > { %2540 = vmatprep.subr.bf16.mxu1 %v2539_v43 }
  0xfc   : > { %2542 = vmatpush3.bf16.xpose.msra.mxu1 %v2539_v43 }
  0xfd   : > { %2544 = vmatprep.subr.bf16.mxu1 %v2543_v60 }
 0x104   : > { %2546 = vmatpush3.bf16.xpose.msra.mxu1 %v2543_v60 }
 0x195   : > { %v2233_v19 = vpop.f32.mrb[0].mxu0 }
 0x196   : > { %v1089_v21 = vadd.f32 %v2233_v19, %v3596_v17  ;;  %v1201_v22 = vadd.f32 %v2233_v19, %v3601_v18  ;;  %v595_v23 = vpop.f32.mrb[1].mxu0 }
 0x197   : > { %v1088_v24 = vadd.f32 %v3596_v17, %v595_v23  ;;  %v1200_v25 = vadd.f32 %v3601_v18, %v595_v23  ;;  %v2547_v23 = vpack.c.bf16 %v510_v11, %v509_v10 }
 0x198   : > { %v2028_v26 = vmul.f32 -1.442695, %v1089_v21  ;;  %v2044_v27 = vmul.f32 -1.442695, %v1201_v22 }
 0x199   : > { %v2027_v28 = vmul.f32 -1.442695, %v1088_v24  ;;  %v2043_v29 = vmul.f32 -1.442695, %v1200_v25  ;;  %v2236_v30 = vpop.f32.mrb[2].mxu0  ;;  %2548 = vmatprep.subr.bf16.mxu1 %v2547_v23 }
 0x19a   : > { %2635 = vpow2.f32 %v2028_v26  ;;  %v1091_v31 = vadd.f32 %v2236_v30, %v3596_v17  ;;  %v1203_v32 = vadd.f32 %v2236_v30, %v3601_v18  ;;  %v605_v33 = vpop.f32.mrb[3].mxu0  ;;  %2550 = vmatpush3.bf16.xpose.msra.mxu1 %v2547_v23 }
 0x19b   : > { %2637 = vpow2.f32 %v2044_v27  ;;  %v1090_v36 = vadd.f32 %v3596_v17, %v605_v33  ;;  %v1202_v37 = vadd.f32 %v3601_v18, %v605_v33 }
 0x19c   : > { %2639 = vpow2.f32 %v2027_v28  ;;  %v2030_v38 = vmul.f32 -1.442695, %v1091_v31  ;;  %v2046_v39 = vmul.f32 -1.442695, %v1203_v32 }
 0x19d   : > { %2641 = vpow2.f32 %v2043_v29  ;;  %v2029_v40 = vmul.f32 -1.442695, %v1090_v36  ;;  %v2045_v41 = vmul.f32 -1.442695, %v1202_v37  ;;  %v2239_v42 = vpop.f32.mrb[4].mxu0 }
 0x19e   : > { %2643 = vpow2.f32 %v2030_v38  ;;  %v615_v44 = vpop.f32.mrb[5].mxu0  ;;  %v1093_v45 = vadd.f32 %v2239_v42, %v3596_v17  ;;  %v1205_v48 = vadd.f32 %v2239_v42, %v3601_v18 }
 0x19f   : > { %2645 = vpow2.f32 %v2046_v39  ;;  %v1092_v46 = vadd.f32 %v3596_v17, %v615_v44  ;;  %v1204_v47 = vadd.f32 %v3601_v18, %v615_v44 }
 0x1a0   : > { %2647 = vpow2.f32 %v2029_v40  ;;  %v2032_v55 = vmul.f32 -1.442695, %v1093_v45  ;;  %v2048_v57 = vmul.f32 -1.442695, %v1205_v48 }
 0x1a1   : > { %2649 = vpow2.f32 %v2045_v41  ;;  %v2031_v49 = vmul.f32 -1.442695, %v1092_v46  ;;  %v2047_v50 = vmul.f32 -1.442695, %v1204_v47  ;;  %v2242_v51 = vpop.f32.mrb[6].mxu0 }
 0x1a2   : > { %v625_v52 = vpop.f32.mrb[7].mxu0  ;;  %v1095_v2 = vadd.f32 %v2242_v51, %v3596_v17  ;;  %v1207_v19 = vadd.f32 %v2242_v51, %v3601_v18 }
 0x1a3   : > { %2651 = vpow2.f32 %v2031_v49  ;;  %v1094_v21 = vadd.f32 %v3596_v17, %v625_v52  ;;  %v1206_v25 = vadd.f32 %v3601_v18, %v625_v52 }
 0x1a4   : > { %v2636_v56 = vpop.eup %2635  ;;  %2653 = vpow2.f32 %v2047_v50  ;;  %v2034_v14 = vmul.f32 -1.442695, %v1095_v2  ;;  %v2050_v31 = vmul.f32 -1.442695, %v1207_v19 }
 0x1a5   : > { %v2638_v58 = vpop.eup %2637  ;;  %v2245_v59 = vpop.f32.mrb[8].mxu0  ;;  %v1153_v0 = vadd.f32 1.0, %v2636_v56  ;;  %2655 = vpow2.f32 %v2032_v55  ;;  %v2033_v34 = vmul.f32 -1.442695, %v1094_v21  ;;  %v2049_v38 = vmul.f32 -1.442695, %v1206_v25 }
 0x1a6   : > { %v2640_v61 = vpop.eup %2639  ;;  %v635_v62 = vpop.f32.mrb[9].mxu0  ;;  %v1265_v4 = vadd.f32 1.0, %v2638_v58  ;;  %2657 = vpow2.f32 %v2048_v57  ;;  %v1097_v29 = vadd.f32 %v2245_v59, %v3596_v17  ;;  %v1209_v32 = vadd.f32 %v2245_v59, %v3601_v18 }
 0x1a7   : > { %v2642_v63 = vpop.eup %2641  ;;  %v1152_v1 = vadd.f32 1.0, %v2640_v61  ;;  %v1096_v35 = vadd.f32 %v3596_v17, %v635_v62  ;;  %v1208_v39 = vadd.f32 %v3601_v18, %v635_v62  ;;  %v482_v61 = vld [vmem:[#allocation7 + $0x18] sm:$0xff] }
 0x1a8   : > { %v2644_v3 = vpop.eup %2643  ;;  %v1264_v5 = vadd.f32 1.0, %v2642_v63  ;;  %v2036_v42 = vmul.f32 -1.442695, %v1097_v29  ;;  %v2052_v44 = vmul.f32 -1.442695, %v1209_v32  ;;  %2347 = vmatmul.mubr.f32.gmra.mrb[18].mxu0 %v482_v61  ;;  %v487_v61 = vld [vmem:[#allocation7 + $0x40] sm:$0xff] }
 0x1a9   : > { %v2646_v6 = vpop.eup %2645  ;;  %2659 = vrcp.f32 %v1152_v1  ;;  %v3618_v7 = vpop.f32.mrb[10].mxu0  ;;  %v1155_v15 = vadd.f32 1.0, %v2644_v3  ;;  %v2035_v47 = vmul.f32 -1.442695, %v1096_v35  ;;  %v2051_v50 = vmul.f32 -1.442695, %v1208_v39 }
 0x1aa   : > { %v2648_v8 = vpop.eup %2647  ;;  %2661 = vrcp.f32 %v1264_v5  ;;  %v645_v9 = vpop.f32.mrb[11].mxu0  ;;  %v1267_v20 = vadd.f32 1.0, %v2646_v6  ;;  %v1099_v54 = vadd.f32 %v3618_v7, %v3596_v17  ;;  %v1211_v57 = vadd.f32 %v3618_v7, %v3601_v18  ;;  %v483_v7 = vld [vmem:[#allocation7 + $0x20] sm:$0xff] }
 0x1ab   : > { %v2650_v12 = vpop.eup %2649  ;;  %2663 = vrcp.f32 %v1153_v0  ;;  %v1154_v13 = vadd.f32 1.0, %v2648_v8  ;;  %v1098_v48 = vadd.f32 %v3596_v17, %v645_v9  ;;  %v1210_v51 = vadd.f32 %v3601_v18, %v645_v9  ;;  %2349 = vmatprep.mubr.f32.mxu0 %v483_v7  ;;  %v513_v7 = vld [vmem:[%s4131_s7] sm:$0xff] }
 0x1ac   : > { %2665 = vrcp.f32 %v1265_v4  ;;  %v1266_v16 = vadd.f32 1.0, %v2650_v12  ;;  %v2038_v1 = vmul.f32 -1.442695, %v1099_v54  ;;  %v2054_v4 = vmul.f32 -1.442695, %v1211_v57 }
 0x1ad   : > { %2667 = vrcp.f32 %v1154_v13  ;;  %v3622_v22 = vpop.f32.mrb[12].mxu0  ;;  %v2652_v24 = vpop.eup %2651  ;;  %v2037_v60 = vmul.f32 -1.442695, %v1098_v48  ;;  %v2053_v63 = vmul.f32 -1.442695, %v1210_v51 }
 0x1ae   : > { %2669 = vrcp.f32 %v1266_v16  ;;  %v3625_v26 = vpop.f32.mrb[13].mxu0  ;;  %v2654_v27 = vpop.eup %2653  ;;  %v1156_v28 = vadd.f32 1.0, %v2652_v24  ;;  %v1101_v12 = vadd.f32 %v3622_v22, %v3596_v17  ;;  %v1213_v19 = vadd.f32 %v3622_v22, %v3601_v18 }
 0x1af   : > { %2671 = vpow2.f32 %v2034_v14  ;;  %v1268_v30 = vadd.f32 1.0, %v2654_v27  ;;  %v2656_v33 = vpop.eup %2655 }
 0x1b0   : > { %2673 = vrcp.f32 %v1155_v15  ;;  %v2658_v37 = vpop.eup %2657  ;;  %v1157_v53 = vadd.f32 1.0, %v2656_v33  ;;  %v1100_v33 = vadd.f32 %v3596_v17, %v3625_v26 }
 0x1b1   : > { %2675 = vrcp.f32 %v1267_v20  ;;  %v3630_v36 = vpop.f32.mrb[14].mxu0  ;;  %v1269_v56 = vadd.f32 1.0, %v2658_v37  ;;  %v484_v20 = vld [vmem:[#allocation7 + $0x28] sm:$0xff] }
 0x1b2   : > { %2677 = vrcp.f32 %v1156_v28  ;;  %v3633_v40 = vpop.f32.mrb[15].mxu0  ;;  %2350 = vmatmul.mubr.f32.gmra.mrb[20].mxu0 %v484_v20  ;;  %v2040_v28 = vmul.f32 -1.442695, %v1101_v12  ;;  %v2039_v48 = vmul.f32 -1.442695, %v1100_v33 }
 0x1b3   : > { %v2660_v41 = vpop.eup %2659  ;;  %2679 = vrcp.f32 %v1268_v30 }
 0x1b4   : > { %v2662_v43 = vpop.eup %2661  ;;  %2681 = vpow2.f32 %v2050_v31  ;;  %v2056_v31 = vmul.f32 -1.442695, %v1213_v19 }
 0x1b5   : > { %v2664_v45 = vpop.eup %2663  ;;  %2683 = vpow2.f32 %v2033_v34  ;;  %v3635_v46 = vmul.f32 %v2662_v43, %v2660_v41  ;;  %v485_v34 = vld [vmem:[#allocation7 + $0x30] sm:$0xff] }
 0x1b6   : > { %v2666_v49 = vpop.eup %2665  ;;  %2685 = vpow2.f32 %v2049_v38  ;;  %v1212_v38 = vadd.f32 %v3601_v18, %v3625_v26  ;;  %2352 = vmatprep.mubr.f32.mxu0 %v485_v34  ;;  %v1214_v26 = vadd.f32 %v3601_v18, %v3633_v40 }
 0x1b7   : > { %v2668_v52 = vpop.eup %2667  ;;  %2687 = vpow2.f32 %v2036_v42  ;;  %1424 = vxpose.xlu0.b32.start [1/16] %v3635_v46, 128  ;;  %v3644_v59 = vmul.f32 %v2666_v49, %v2664_v45  ;;  %v486_v45 = vld [vmem:[#allocation7 + $0x38] sm:$0xff]  ;;  %v1102_v49 = vadd.f32 %v3596_v17, %v3633_v40 }
 0x1b8   : > { %v2670_v55 = vpop.eup %2669  ;;  %2689 = vpow2.f32 %v2052_v44  ;;  %2353 = vmatmul.mubr.f32.gmra.mrb[22].mxu0 %v486_v45  ;;  %v2057_v40 = vmul.f32 -1.442695, %v1214_v26  ;;  %v517_v26 = vld [vmem:[%s4131_s7 + $0x20] sm:$0xff] }
 0x1b9   : > { %v2672_v58 = vpop.eup %2671  ;;  %2691 = vpow2.f32 %v2035_v47  ;;  %v3647_v2 = vmul.f32 %v2670_v55, %v2668_v52  ;;  %2355 = vmatprep.mubr.f32.mxu0 %v487_v61  ;;  %v519_v61 = vld [vmem:[%s4131_s7 + $0x30] sm:$0xff] }
 0x1ba   : > { %v2674_v62 = vpop.eup %2673  ;;  %2693 = vpow2.f32 %v2051_v50  ;;  %v1159_v10 = vadd.f32 1.0, %v2672_v58  ;;  %v2055_v50 = vmul.f32 -1.442695, %v1212_v38  ;;  %v492_v38 = vld [vmem:[#allocation7 + $0x68] sm:$0xff] }
 0x1bb   : > { %v2676_v0 = vpop.eup %2675  ;;  %2695 = vrcp.f32 %v1157_v53  ;;  %1425 = vxpose.xlu0.b32.cont [2/16] %v3644_v59, 128  ;;  %v1103_v53 = vadd.f32 %v3630_v36, %v3596_v17 }
 0x1bc   : > { %v2678_v3 = vpop.eup %2677  ;;  %2697 = vrcp.f32 %v1269_v56  ;;  %v3652_v16 = vmul.f32 %v2676_v0, %v2674_v62  ;;  %v1215_v56 = vadd.f32 %v3630_v36, %v3601_v18 }
 0x1bd   : > { %v2680_v5 = vpop.eup %2679  ;;  %2699 = vpow2.f32 %v2037_v60  ;;  %v2041_v60 = vmul.f32 -1.442695, %v1102_v49  ;;  %v2042_v0 = vmul.f32 -1.442695, %v1103_v53  ;;  %v518_v53 = vld [vmem:[%s4131_s7 + $0x28] sm:$0xff] }
 0x1be   : > { %v2682_v6 = vpop.eup %2681  ;;  %2701 = vpow2.f32 %v2053_v63  ;;  %v3657_v24 = vmul.f32 %v2680_v5, %v2678_v3  ;;  %v2058_v3 = vmul.f32 -1.442695, %v1215_v56 }
 0x1bf   : > { %v2684_v8 = vpop.eup %2683  ;;  %2703 = vpow2.f32 %v2038_v1  ;;  %1426 = vxpose.xlu0.b32.cont [3/16] %v3647_v2, 128  ;;  %v1271_v14 = vadd.f32 1.0, %v2682_v6  ;;  %v3158_v6 = vmov 0  }
 0x1c0   : > { %v2686_v9 = vpop.eup %2685  ;;  %v1158_v11 = vadd.f32 1.0, %v2684_v8  ;;  %2705 = vpow2.f32 %v2054_v4  ;;  %v488_v4 = vld [vmem:[#allocation7 + $0x48] sm:$0xff]  ;;  %2633 = vset.pattern.permute.xlu1 %v3158_v6 }
 0x1c1   : > { %v2688_v13 = vpop.eup %2687  ;;  %v1270_v15 = vadd.f32 1.0, %v2686_v9  ;;  %2356 = vmatmul.mubr.f32.gmra.mrb[24].mxu0 %v488_v4  ;;  %1346 = vperm.xlu1 %2633, %v513_v7   ;;  %v523_v7 = vld [vmem:[%s4131_s7 + $0x50] sm:$0xff] }
 0x1c2   : > { %v2690_v21 = vpop.eup %2689  ;;  %2707 = vrcp.f32 %v1158_v11  ;;  %v1161_v22 = vadd.f32 1.0, %v2688_v13  ;;  %v514_v13 = vld [vmem:[%s4131_s7 + $0x8] sm:$0xff] }
 0x1c3   : > { %v2692_v23 = vpop.eup %2691  ;;  %2709 = vrcp.f32 %v1270_v15  ;;  %1427 = vxpose.xlu0.b32.cont [4/16] %v3652_v16, 128  ;;  %v1273_v37 = vadd.f32 1.0, %v2690_v21 }
 0x1c4   : > { %v2694_v25 = vpop.eup %2693  ;;  %2711 = vrcp.f32 %v1159_v10  ;;  %v1160_v27 = vadd.f32 1.0, %v2692_v23 }
 0x1c5   : > { %v2696_v29 = vpop.eup %2695  ;;  %2713 = vrcp.f32 %v1271_v14  ;;  %v1272_v30 = vadd.f32 1.0, %v2694_v25  ;;  %v489_v14 = vld [vmem:[#allocation7 + $0x50] sm:$0xff]  ;;  %1351 = vperm.xlu1 %2633, %v514_v13   ;;  %v490_v25 = vld [vmem:[#allocation7 + $0x58] sm:$0xff] }
 0x1c6   : > { %v2698_v32 = vpop.eup %2697  ;;  %2715 = vrcp.f32 %v1160_v27  ;;  %2358 = vmatprep.mubr.f32.mxu0 %v489_v14  ;;  %v528_v13 = vld [vmem:[%s4131_s7 + $0x78] sm:$0xff] }
 0x1c7   : > { %v2700_v35 = vpop.eup %2699  ;;  %2717 = vrcp.f32 %v1272_v30  ;;  %1428 = vxpose.xlu0.b32.cont [5/16] %v3657_v24, 128  ;;  %v3664_v44 = vmul.f32 %v2698_v32, %v2696_v29  ;;  %2359 = vmatmul.mubr.f32.gmra.mrb[26].mxu0 %v490_v25  ;;  %v491_v32 = vld [vmem:[#allocation7 + $0x60] sm:$0xff]  ;;  %v2289_v25 = vpop.f32.mrb[0].mxu1 }
 0x1c8   : > { %v2702_v39 = vpop.eup %2701  ;;  %v1162_v41 = vadd.f32 1.0, %v2700_v35  ;;  %2719 = vpow2.f32 %v2040_v28  ;;  %2361 = vmatprep.mubr.f32.mxu0 %v491_v32 }
 0x1c9   : > { %v2704_v42 = vpop.eup %2703  ;;  %v1274_v43 = vadd.f32 1.0, %v2702_v39  ;;  %2721 = vpow2.f32 %v2056_v31  ;;  %v515_v31 = vld [vmem:[%s4131_s7 + $0x10] sm:$0xff] }
 0x1ca   : > { %v2706_v47 = vpop.eup %2705  ;;  %2723 = vrcp.f32 %v1161_v22  ;;  %v1163_v52 = vadd.f32 1.0, %v2704_v42  ;;  %1356 = vperm.xlu1 %2633, %v515_v31   ;;  %v516_v42 = vld [vmem:[%s4131_s7 + $0x18] sm:$0xff] }
 0x1cb   : > { %2725 = vrcp.f32 %v1273_v37  ;;  %1429 = vxpose.xlu0.b32.cont [6/16] %v3664_v44, 128  ;;  %v1275_v55 = vadd.f32 1.0, %v2706_v47  ;;  %2362 = vmatmul.mubr.f32.gmra.mrb[28].mxu0 %v492_v38 }
 0x1cc   : > { %v2708_v51 = vpop.eup %2707  ;;  %2727 = vrcp.f32 %v1162_v41 }
 0x1cd   : > { %v2710_v54 = vpop.eup %2709  ;;  %2729 = vrcp.f32 %v1274_v43  ;;  %v493_v43 = vld [vmem:[#allocation7 + $0x70] sm:$0xff] }
 0x1ce   : > { %v2712_v57 = vpop.eup %2711  ;;  %2731 = vpow2.f32 %v2039_v48  ;;  %v3675_v58 = vmul.f32 %v2710_v54, %v2708_v51  ;;  %1361 = vperm.xlu1 %2633, %v516_v42   ;;  %2364 = vmatprep.mubr.f32.mxu0 %v493_v43  ;;  %v494_v48 = vld [vmem:[#allocation7 + $0x78] sm:$0xff] }
 0x1cf   : > { %v2714_v62 = vpop.eup %2713  ;;  %2733 = vpow2.f32 %v2055_v50  ;;  %2365 = vmatmul.mubr.f32.gmra.mrb[30].mxu0 %v494_v48  ;;  %v752_v48 = vadd.f32 %v2289_v25, %v3596_v17 }
 0x1d0   : > { %v2716_v63 = vpop.eup %2715  ;;  %2735 = vrcp.f32 %v1163_v52  ;;  %1430 = vxpose.xlu0.b32.cont [7/16] %v3675_v58, 128  ;;  %v3678_v5 = vmul.f32 %v2714_v62, %v2712_v57 }
 0x1d1   : > { %v2718_v1 = vpop.eup %2717  ;;  %2737 = vrcp.f32 %v1275_v55 }
 0x1d2   : > { %v2720_v36 = vpop.eup %2719  ;;  %2739 = vpow2.f32 %v2041_v60  ;;  %v3685_v10 = vmul.f32 %v2718_v1, %v2716_v63  ;;  %1366 = vperm.xlu1 %2633, %v517_v26   ;;  %v520_v63 = vld [vmem:[%s4131_s7 + $0x38] sm:$0xff] }
 0x1d3   : > { %v2722_v8 = vpop.eup %2721  ;;  %2741 = vpow2.f32 %v2057_v40  ;;  %v1165_v21 = vadd.f32 1.0, %v2720_v36  ;;  %v522_v36 = vld [vmem:[%s4131_s7 + $0x48] sm:$0xff] }
 0x1d4   : > { %v2724_v9 = vpop.eup %2723  ;;  %2743 = vpow2.f32 %v2042_v0  ;;  %1431 = vxpose.xlu0.b32.cont [8/16] %v3678_v5, 128  ;;  %v1277_v28 = vadd.f32 1.0, %v2722_v8  ;;  %v524_v8 = vld [vmem:[%s4131_s7 + $0x58] sm:$0xff] }
 0x1d5   : > { %v2726_v11 = vpop.eup %2725  ;;  %2745 = vpow2.f32 %v2058_v3  ;;  %v521_v3 = vld [vmem:[%s4131_s7 + $0x40] sm:$0xff] }
 0x1d6   : > { %v2728_v12 = vpop.eup %2727  ;;  %v3691_v30 = vmul.f32 %v2726_v11, %v2724_v9  ;;  %1371 = vperm.xlu1 %2633, %v518_v53   ;;  %v525_v9 = vld [vmem:[%s4131_s7 + $0x60] sm:$0xff]  ;;  %v526_v11 = vld [vmem:[%s4131_s7 + $0x68] sm:$0xff]  ;;  %v2011_v53 = vmul.f32 -1.442695, %v752_v48 }
 0x1d7   : > { %v2730_v15 = vpop.eup %2729 }
 0x1d8   : > { %v2732_v19 = vpop.eup %2731  ;;  %1432 = vxpose.xlu0.b32.cont [9/16] %v3685_v10, 128  ;;  %v3697_v34 = vmul.f32 %v2730_v15, %v2728_v12  ;;  %v527_v12 = vld [vmem:[%s4131_s7 + $0x70] sm:$0xff] }
 0x1d9   : > { %v2734_v20 = vpop.eup %2733  ;;  %v1164_v23 = vadd.f32 1.0, %v2732_v19 }
 0x1da   : > { %v2736_v27 = vpop.eup %2735  ;;  %v1276_v29 = vadd.f32 1.0, %v2734_v20  ;;  %1376 = vperm.xlu1 %2633, %v519_v61  }
 0x1db   : > { %v2738_v22 = vpop.eup %2737  ;;  %2747 = vrcp.f32 %v1164_v23 }
 0x1dc   : > { %v2740_v33 = vpop.eup %2739  ;;  %2749 = vrcp.f32 %v1276_v29  ;;  %1433 = vxpose.xlu0.b32.cont [10/16] %v3691_v30, 128  ;;  %v3703_v50 = vmul.f32 %v2738_v22, %v2736_v27  ;;  %v746_v27 = vpop.f32.mrb[1].mxu1 }
 0x1dd   : > { %v2742_v35 = vpop.eup %2741  ;;  %2751 = vrcp.f32 %v1165_v21  ;;  %v1166_v37 = vadd.f32 1.0, %v2740_v33  ;;  %v2292_v32 = vpop.f32.mrb[2].mxu1  ;;  %v747_v26 = vadd.f32 %v3596_v17, %v746_v27 }
 0x1de   : > { %v2744_v39 = vpop.eup %2743  ;;  %2753 = vrcp.f32 %v1277_v28  ;;  %v1278_v41 = vadd.f32 1.0, %v2742_v35  ;;  %1381 = vperm.xlu1 %2633, %v520_v63   ;;  %v2345_v28 = vpop.f32.mrb[16].mxu0 }
 0x1df   : > { %v2746_v45 = vpop.eup %2745  ;;  %2755 = vrcp.f32 %v1166_v37  ;;  %v1167_v47 = vadd.f32 1.0, %v2744_v39  ;;  %v993_v29 = vpop.f32.mrb[17].mxu0 }
 0x1e0   : > { %2757 = vrcp.f32 %v1278_v41  ;;  %1434 = vxpose.xlu0.b32.cont [11/16] %v3697_v34, 128  ;;  %v1279_v49 = vadd.f32 1.0, %v2746_v45 }
 0x1e1   : > { %2759 = vrcp.f32 %v1167_v47 }
 0x1e2   : > { %2761 = vrcp.f32 %v1279_v49  ;;  %1386 = vperm.xlu1 %2633, %v521_v3  }
 0x1e3   : > { %2763 = vpow2.f32 %v2011_v53 }
 0x1e4   : > { %1435 = vxpose.xlu0.b32.cont [12/16] %v3703_v50, 128 }
 0x1e5   : > { %v2748_v51 = vpop.eup %2747 }
 0x1e6   : > { %v2750_v52 = vpop.eup %2749  ;;  %1391 = vperm.xlu1 %2633, %v522_v36  }
 0x1e7   : > { %v2752_v54 = vpop.eup %2751  ;;  %v3712_v55 = vmul.f32 %v2750_v52, %v2748_v51 }
 0x1e8   : > { %v2754_v56 = vpop.eup %2753 }
 0x1e9   : > { %v2756_v57 = vpop.eup %2755  ;;  %1436 = vxpose.xlu0.b32.cont [13/16] %v3712_v55, 128  ;;  %v3718_v62 = vmul.f32 %v2754_v56, %v2752_v54  ;;  %v2010_v56 = vmul.f32 -1.442695, %v747_v26 }
 0x1ea   : > { %v2758_v60 = vpop.eup %2757  ;;  %1396 = vperm.xlu1 %2633, %v523_v7   ;;  %v999_v7 = vadd.f32 %v2345_v28, %v3601_v18 }
 0x1eb   : > { %v3721_v40 = vmul.f32 %v2758_v60, %v2756_v57  ;;  %v2760_v0 = vpop.eup %2759  ;;  %2765 = vpow2.f32 %v2010_v56 }
 0x1ec   : > { %v2762_v1 = vpop.eup %2761  ;;  %2767 = vtanh.f32 %v999_v7 }
 0x1ed   : > { %1437 = vxpose.xlu0.b32.cont [14/16] %v3718_v62, 128  ;;  %v3730_v4 = vmul.f32 %v2762_v1, %v2760_v0  ;;  %v2764_v1 = vpop.eup %2763 }
 0x1ee   : > { %1401 = vperm.xlu1 %2633, %v524_v8   ;;  %v762_v8 = vadd.f32 %v2292_v32, %v3596_v17 }
 0x1f1   : > { %1438 = vxpose.xlu0.b32.cont [15/16] %v3721_v40, 128 }
 0x1f2   : > { %1406 = vperm.xlu1 %2633, %v525_v9   ;;  %v994_v9 = vadd.f32 %v3601_v18, %v993_v29 }
 0x1f4   : > { %2769 = vtanh.f32 %v994_v9 }
 0x1f5   : > { %1439 = vxpose.xlu0.b32.end [16/16] %v3730_v4, 128  ;;  %v2766_v3 = vpop.eup %2765 }
 0x1f6   : > { %1411 = vperm.xlu1 %2633, %v526_v11   ;;  %v2768_v25 = vpop.eup %2767 }
 0x1fa   : > { %1416 = vperm.xlu1 %2633, %v527_v12   ;;  %v874_v12 = vadd.f32 1.0, %v2764_v1 }
 0x1fc   : > { %2771 = vrcp.f32 %v874_v12 }
 0x1fe   : > { %1421 = vperm.xlu1 %2633, %v528_v13   ;;  %v873_v13 = vadd.f32 1.0, %v2766_v3  ;;  %v2770_v27 = vpop.eup %2769 }
 0x200   : > { %2773 = vrcp.f32 %v873_v13 }
 0x206   : > { %v2772_v29 = vpop.eup %2771 }
 0x20a   : > { %v2774_v32 = vpop.eup %2773 }
 0x21e   : > { %2634 = vset.pattern.permute.xlu0 %v3158_v6  ;;  %v756_v6 = vpop.f32.mrb[3].mxu1 }
 0x21f   : > { %v2295_v33 = vpop.f32.mrb[4].mxu1  ;;  %v757_v11 = vadd.f32 %v3596_v17, %v756_v6 }
 0x220   : > { %v766_v35 = vpop.f32.mrb[5].mxu1 }
 0x221   : > { %v2298_v38 = vpop.f32.mrb[6].mxu1 }
 0x222   : > { %v776_v39 = vpop.f32.mrb[7].mxu1  ;;  %v782_v28 = vadd.f32 %v2298_v38, %v3596_v17 }
 0x223   : > { %v3755_v42 = vpop.f32.mrb[8].mxu1 }
 0x224   : > { %v3757_v43 = vpop.f32.mrb[9].mxu1  ;;  %v792_v26 = vadd.f32 %v3755_v42, %v3596_v17 }
 0x225   : > { %v3759_v47 = vpop.f32.mrb[10].mxu1  ;;  %v787_v38 = vadd.f32 %v3596_v17, %v3757_v43 }
 0x226   : > { %v3762_v49 = vpop.f32.mrb[11].mxu1  ;;  %v802_v43 = vadd.f32 %v3759_v47, %v3596_v17 }
 0x227   : > { %v3765_v52 = vpop.f32.mrb[12].mxu1  ;;  %v2018_v1 = vmul.f32 -1.442695, %v787_v38 }
 0x228   : > { %v3767_v54 = vpop.f32.mrb[13].mxu1  ;;  %v812_v7 = vadd.f32 %v3765_v52, %v3596_v17 }
 0x229   : > { %v3769_v60 = vpop.f32.mrb[14].mxu1  ;;  %v807_v52 = vadd.f32 %v3596_v17, %v3767_v54 }
 0x22a   : > { %v3771_v61 = vpop.f32.mrb[15].mxu1 }
 0x239   : > { %v1440_v14 = vpop.trf.xlu0 }
 0x23a   : > { %2399 = vmatprep.mubr.f32.mxu1 %v1440_v14  ;;  %v2013_v14 = vmul.f32 -1.442695, %v762_v8 }
 0x23c   : > { %2775 = vpow2.f32 %v2013_v14  ;;  %v2021_v14 = vmul.f32 -1.442695, %v802_v43 }
 0x23d   : > { %v1441_v15 = vpop.trf.xlu0 }
 0x23e   : > { %2400 = vmatmul.mubr.f32.vlgmr.msra.gmra.mrb[16].mxu1 %v1441_v15  ;;  %v2012_v15 = vmul.f32 -1.442695, %v757_v11 }
 0x240   : > { %2777 = vpow2.f32 %v2012_v15 }
 0x241   : > { %v1442_v19 = vpop.trf.xlu0 }
 0x242   : > { %2402 = vmatprep.mubr.f32.mxu1 %v1442_v19  ;;  %v772_v19 = vadd.f32 %v2295_v33, %v3596_v17  ;;  %v3781_v33 = vmul.f32 %v2772_v29, %v2768_v25 }
 0x245   : > { %v1443_v20 = vpop.trf.xlu0 }
 0x246   : > { %2403 = vmatmul.mubr.f32.gmra.mrb[18].mxu1 %v1443_v20  ;;  %v767_v20 = vadd.f32 %v3596_v17, %v766_v35  ;;  %v2776_v6 = vpop.eup %2775 }
 0x247   : > { %v876_v35 = vadd.f32 1.0, %v2776_v6 }
 0x249   : > { %v1444_v21 = vpop.trf.xlu0 }
 0x24a   : > { %2405 = vmatprep.mubr.f32.mxu1 %v1444_v21  ;;  %v2015_v21 = vmul.f32 -1.442695, %v772_v19 }
 0x24c   : > { %2779 = vpow2.f32 %v2015_v21 }
 0x24d   : > { %v1445_v23 = vpop.trf.xlu0 }
 0x24e   : > { %2406 = vmatmul.mubr.f32.gmra.mrb[20].mxu1 %v1445_v23  ;;  %v2014_v23 = vmul.f32 -1.442695, %v767_v20 }
 0x250   : > { %2781 = vpow2.f32 %v2014_v23 }
 0x251   : > { %v1446_v31 = vpop.trf.xlu0 }
 0x252   : > { %2408 = vmatprep.mubr.f32.mxu1 %v1446_v31  ;;  %v777_v31 = vadd.f32 %v3596_v17, %v776_v39 }
 0x255   : > { %v1447_v22 = vpop.trf.xlu0 }
 0x256   : > { %2409 = vmatmul.mubr.f32.gmra.mrb[22].mxu1 %v1447_v22  ;;  %v2778_v22 = vpop.eup %2777 }
 0x257   : > { %v875_v48 = vadd.f32 1.0, %v2778_v22  ;;  %v2780_v56 = vpop.eup %2779  ;;  %v2022_v22 = vmul.f32 -1.442695, %v807_v52 }
 0x258   : > { %v878_v42 = vadd.f32 1.0, %v2780_v56 }
 0x259   : > { %v1448_v37 = vpop.trf.xlu0 }
 0x25a   : > { %2411 = vmatprep.mubr.f32.mxu1 %v1448_v37  ;;  %v2017_v37 = vmul.f32 -1.442695, %v782_v28 }
 0x25c   : > { %2783 = vpow2.f32 %v2017_v37  ;;  %v817_v37 = vadd.f32 %v3596_v17, %v3771_v61 }
 0x25d   : > { %v1449_v41 = vpop.trf.xlu0 }
 0x25e   : > { %2412 = vmatmul.mubr.f32.gmra.mrb[24].mxu1 %v1449_v41  ;;  %v2016_v41 = vmul.f32 -1.442695, %v777_v31 }
 0x260   : > { %2785 = vpow2.f32 %v2016_v41 }
 0x261   : > { %v1450_v45 = vpop.trf.xlu0  ;;  %2787 = vrcp.f32 %v876_v35 }
 0x262   : > { %2414 = vmatprep.mubr.f32.mxu1 %v1450_v45  ;;  %v3783_v45 = vmul.f32 %v2774_v32, %v2770_v27  ;;  %2789 = vrcp.f32 %v875_v48  ;;  %v822_v32 = vadd.f32 %v3769_v60, %v3596_v17 }
 0x265   : > { %v1451_v51 = vpop.trf.xlu0 }
 0x266   : > { %2415 = vmatmul.mubr.f32.gmra.mrb[26].mxu1 %v1451_v51 }
 0x269   : > { %v1452_v57 = vpop.trf.xlu0 }
 0x26a   : > { %2417 = vmatprep.mubr.f32.mxu1 %v1452_v57  ;;  %v2019_v57 = vmul.f32 -1.442695, %v792_v26 }
 0x26d   : > { %v1453_v63 = vpop.trf.xlu0 }
 0x26e   : > { %2418 = vmatmul.mubr.f32.gmra.mrb[28].mxu1 %v1453_v63 }
 0x271   : > { %v1454_v0 = vpop.trf.xlu0 }
 0x272   : > { %2420 = vmatprep.mubr.f32.mxu1 %v1454_v0  ;;  %v2782_v0 = vpop.eup %2781 }
 0x273   : > { %v877_v3 = vadd.f32 1.0, %v2782_v0  ;;  %v2784_v9 = vpop.eup %2783 }
 0x274   : > { %v2786_v13 = vpop.eup %2785  ;;  %v880_v23 = vadd.f32 1.0, %v2784_v9 }
 0x275   : > { %v1455_v36 = vpop.trf.xlu0  ;;  %v2788_v19 = vpop.eup %2787  ;;  %v879_v27 = vadd.f32 1.0, %v2786_v13 }
 0x276   : > { %2421 = vmatmul.mubr.f32.gmra.mrb[30].mxu1 %v1455_v36  ;;  %v797_v36 = vadd.f32 %v3596_v17, %v3762_v49  ;;  %v2790_v20 = vpop.eup %2789  ;;  %v2023_v49 = vmul.f32 -1.442695, %v812_v7 }
 0x278   : > { %v2020_v47 = vmul.f32 -1.442695, %v797_v36 }
 0x27b   : > { %v2348_v39 = vpop.f32.mrb[18].mxu0 }
 0x27c   : > { %v1009_v51 = vadd.f32 %v2348_v39, %v3601_v18  ;;  %v1003_v53 = vpop.f32.mrb[19].mxu0 }
 0x27d   : > { %v1004_v63 = vadd.f32 %v3601_v18, %v1003_v53  ;;  %v2024_v53 = vmul.f32 -1.442695, %v817_v37 }
 0x27e   : > { %2791 = vtanh.f32 %v1009_v51  ;;  %v2025_v51 = vmul.f32 -1.442695, %v822_v32 }
 0x27f   : > { %2793 = vtanh.f32 %v1004_v63 }
 0x280   : > { %2795 = vpow2.f32 %v2019_v57 }
 0x281   : > { %2797 = vpow2.f32 %v2018_v1  ;;  %v2923_v1 = vld [vmem:[%s4130_s6] ss:$0 sm:$0xff] }
 0x282   : > { %2799 = vrcp.f32 %v878_v42 }
 0x283   : > { %2801 = vrcp.f32 %v877_v3 }
 0x285   : > { %v2351_v8 = vpop.f32.mrb[20].mxu0 }
 0x286   : > { %v1019_v11 = vadd.f32 %v2351_v8, %v3601_v18  ;;  %v1013_v12 = vpop.f32.mrb[21].mxu0 }
 0x287   : > { %v1014_v15 = vadd.f32 %v3601_v18, %v1013_v12 }
 0x288   : > { %2803 = vtanh.f32 %v1019_v11  ;;  %v2792_v21 = vpop.eup %2791 }
 0x289   : > { %2805 = vtanh.f32 %v1014_v15  ;;  %v2794_v25 = vpop.eup %2793  ;;  %v3801_v28 = vmul.f32 %v2792_v21, %v2788_v19 }
 0x28a   : > { %2807 = vpow2.f32 %v2021_v14  ;;  %v3803_v29 = vmul.f32 %v2794_v25, %v2790_v20  ;;  %v2796_v31 = vpop.eup %2795 }
 0x28b   : > { %2809 = vpow2.f32 %v2020_v47  ;;  %v2354_v6 = vpop.f32.mrb[22].mxu0  ;;  %v2798_v35 = vpop.eup %2797  ;;  %v882_v38 = vadd.f32 1.0, %v2796_v31 }
 0x28c   : > { %2811 = vpow2.f32 %v2023_v49  ;;  %v1029_v54 = vadd.f32 %v2354_v6, %v3601_v18  ;;  %v1023_v41 = vpop.f32.mrb[23].mxu0  ;;  %v2800_v26 = vpop.eup %2799  ;;  %v881_v57 = vadd.f32 1.0, %v2798_v35 }
 0x28d   : > { %2813 = vrcp.f32 %v880_v23  ;;  %v1024_v48 = vadd.f32 %v3601_v18, %v1023_v41  ;;  %v2802_v39 = vpop.eup %2801 }
 0x28e   : > { %2815 = vrcp.f32 %v879_v27 }
 0x28f   : > { %2817 = vtanh.f32 %v1029_v54 }
 0x290   : > { %2819 = vtanh.f32 %v1024_v48 }
 0x291   : > { %2821 = vpow2.f32 %v2022_v22 }
 0x292   : > { %v2804_v60 = vpop.eup %2803  ;;  %2823 = vrcp.f32 %v882_v38 }
 0x293   : > { %v2806_v56 = vpop.eup %2805  ;;  %v3811_v63 = vmul.f32 %v2804_v60, %v2800_v26  ;;  %2825 = vpow2.f32 %v2025_v51 }
 0x294   : > { %v3813_v17 = vmul.f32 %v2806_v56, %v2802_v39  ;;  %v2808_v61 = vpop.eup %2807  ;;  %v2357_v0 = vpop.f32.mrb[24].mxu0  ;;  %2827 = vpow2.f32 %v2024_v53 }
 0x295   : > { %v2810_v18 = vpop.eup %2809  ;;  %v1039_v42 = vadd.f32 %v2923_v1, %v2357_v0  ;;  %v1033_v3 = vpop.f32.mrb[25].mxu0  ;;  %2829 = vrcp.f32 %v881_v57  ;;  %v884_v11 = vadd.f32 1.0, %v2808_v61 }
 0x296   : > { %v2812_v43 = vpop.eup %2811  ;;  %v1034_v36 = vadd.f32 %v2923_v1, %v1033_v3  ;;  %v883_v13 = vadd.f32 1.0, %v2810_v18 }
 0x297   : > { %v2814_v7 = vpop.eup %2813  ;;  %2831 = vtanh.f32 %v1039_v42  ;;  %v886_v49 = vadd.f32 1.0, %v2812_v43 }
 0x298   : > { %v2816_v8 = vpop.eup %2815  ;;  %2833 = vtanh.f32 %v1034_v36 }
 0x299   : > { %v2818_v9 = vpop.eup %2817  ;;  %2835 = vrcp.f32 %v884_v11 }
 0x29a   : > { %v2820_v12 = vpop.eup %2819  ;;  %v3818_v14 = vmul.f32 %v2818_v9, %v2814_v7  ;;  %v2360_v47 = vpop.f32.mrb[26].mxu0  ;;  %2837 = vrcp.f32 %v883_v13 }
 0x29b   : > { %v2822_v15 = vpop.eup %2821  ;;  %v3820_v19 = vmul.f32 %v2820_v12, %v2816_v8  ;;  %v1049_v21 = vadd.f32 %v2923_v1, %v2360_v47  ;;  %v1043_v23 = vpop.f32.mrb[27].mxu0 }
 0x29c   : > { %v2824_v20 = vpop.eup %2823  ;;  %v885_v25 = vadd.f32 1.0, %v2822_v15  ;;  %v1044_v27 = vadd.f32 %v2923_v1, %v1043_v23 }
 0x29d   : > { %v2826_v52 = vpop.eup %2825  ;;  %2839 = vtanh.f32 %v1049_v21 }
 0x29e   : > { %v2828_v31 = vpop.eup %2827  ;;  %2841 = vtanh.f32 %v1044_v27  ;;  %v2363_v6 = vpop.f32.mrb[28].mxu0  ;;  %v888_v37 = vadd.f32 1.0, %v2826_v52 }
 0x29f   : > { %v2830_v32 = vpop.eup %2829  ;;  %2843 = vrcp.f32 %v886_v49  ;;  %v1059_v54 = vadd.f32 %v2923_v1, %v2363_v6  ;;  %v1053_v41 = vpop.f32.mrb[29].mxu0  ;;  %v887_v48 = vadd.f32 1.0, %v2828_v31 }
 0x2a0   : > { %2845 = vrcp.f32 %v885_v25  ;;  %v1054_v26 = vadd.f32 %v2923_v1, %v1053_v41  ;;  %v1347_v49 = vpop.permute.xlu1 %1346 }
 0x2a1   : > { %v2832_v22 = vpop.eup %2831  ;;  %2847 = vtanh.f32 %v1059_v54 }
 0x2a2   : > { %v2834_v35 = vpop.eup %2833  ;;  %v3822_v38 = vmul.f32 %v2832_v22, %v2824_v20  ;;  %2849 = vtanh.f32 %v1054_v26  ;;  %v2366_v51 = vpop.f32.mrb[30].mxu0 }
 0x2a3   : > { %v3824_v39 = vmul.f32 %v2834_v35, %v2830_v32  ;;  %2851 = vrcp.f32 %v888_v37  ;;  %v1069_v60 = vadd.f32 %v2923_v1, %v2366_v51  ;;  %v1063_v53 = vpop.f32.mrb[31].mxu0  ;;  %v2836_v57 = vpop.eup %2835 }
 0x2a4   : > { %2853 = vrcp.f32 %v887_v48  ;;  %v1064_v56 = vadd.f32 %v2923_v1, %v1063_v53  ;;  %v2838_v61 = vpop.eup %2837  ;;  %v1352_v21 = vpop.permute.xlu1 %1351 }
 0x2a5   : > { %2855 = vtanh.f32 %v1069_v60 }
 0x2a6   : > { %2857 = vtanh.f32 %v1064_v56 }
 0x2a7   : > { %v2840_v0 = vpop.eup %2839 }
 0x2a8   : > { %v2842_v18 = vpop.eup %2841  ;;  %v3826_v42 = vmul.f32 %v2840_v0, %v2836_v57  ;;  %v1357_v23 = vpop.permute.xlu1 %1356 }
 0x2a9   : > { %v2844_v3 = vpop.eup %2843  ;;  %v3828_v43 = vmul.f32 %v2842_v18, %v2838_v61 }
 0x2aa   : > { %v2846_v36 = vpop.eup %2845 }
 0x2ab   : > { %v2848_v7 = vpop.eup %2847 }
 0x2ac   : > { %v2850_v8 = vpop.eup %2849  ;;  %v3830_v11 = vmul.f32 %v2848_v7, %v2844_v3  ;;  %v1362_v52 = vpop.permute.xlu1 %1361 }
 0x2ad   : > { %v2852_v9 = vpop.eup %2851  ;;  %v3832_v12 = vmul.f32 %v2850_v8, %v2846_v36 }
 0x2ae   : > { %v2854_v1 = vpop.eup %2853 }
 0x2af   : > { %v2856_v13 = vpop.eup %2855 }
 0x2b0   : > { %v2858_v15 = vpop.eup %2857  ;;  %v3834_v47 = vmul.f32 %v2856_v13, %v2852_v9  ;;  %v1367_v25 = vpop.permute.xlu1 %1366 }
 0x2b1   : > { %v3836_v20 = vmul.f32 %v2858_v15, %v2854_v1 }
 0x2b4   : > { %v1372_v27 = vpop.permute.xlu1 %1371 }
 0x2b8   : > { %v1377_v22 = vpop.permute.xlu1 %1376 }
 0x2bc   : > { %v1382_v35 = vpop.permute.xlu1 %1381 }
 0x311   : > { %v2401_v31 = vpop.f32.mrb[16].mxu1 }
 0x312   : > { %v1528_v32 = vadd.f32 %v2401_v31, %v1352_v21  ;;  %v1522_v6 = vpop.f32.mrb[17].mxu1 }
 0x313   : > { %v1523_v37 = vadd.f32 %v1522_v6, %v1347_v49 }
 0x314   : > { %v3839_v54 = vmul.f32 %v1528_v32, %v3781_v33  ;;  %v1387_v33 = vpop.permute.xlu1 %1386 }
 0x315   : > { %v3842_v41 = vmul.f32 %v1523_v37, %v3783_v45 }
 0x316   : > { %1619 = vmax.xlane.f32.xlu1 %v3839_v54 }
 0x317   : > { %1617 = vmax.xlane.f32.xlu0 %v3842_v41 }
 0x318   : > { %v1392_v3 = vpop.permute.xlu1 %1391 }
 0x319   : > { %v2404_v48 = vpop.f32.mrb[18].mxu1 }
 0x31a   : > { %v1538_v26 = vadd.f32 %v2404_v48, %v1362_v52  ;;  %v1532_v51 = vpop.f32.mrb[19].mxu1 }
 0x31b   : > { %v1533_v60 = vadd.f32 %v1532_v51, %v1357_v23 }
 0x31c   : > { %v3847_v53 = vmul.f32 %v1538_v26, %v3801_v28  ;;  %v1397_v8 = vpop.permute.xlu1 %1396 }
 0x31d   : > { %v3850_v56 = vmul.f32 %v1533_v60, %v3803_v29 }
 0x31e   : > { %1623 = vmax.xlane.f32.xlu1 %v3847_v53 }
 0x321   : > { %v2407_v45 = vpop.f32.mrb[20].mxu1 }
 0x322   : > { %v1548_v57 = vadd.f32 %v2407_v45, %v1372_v27  ;;  %v1542_v61 = vpop.f32.mrb[21].mxu1  ;;  %1621 = vmax.xlane.f32.xlu1 %v3850_v56 }
 0x323   : > { %v1543_v0 = vadd.f32 %v1542_v61, %v1367_v25 }
 0x324   : > { %v3855_v18 = vmul.f32 %v1548_v57, %v3811_v63  ;;  %v1402_v63 = vpop.permute.xlu1 %1401 }
 0x325   : > { %v3858_v36 = vmul.f32 %v1543_v0, %v3813_v17 }
 0x326   : > { %1627 = vmax.xlane.f32.xlu0 %v3855_v18 }
 0x327   : > { %1625 = vmax.xlane.f32.xlu1 %v3858_v36 }
 0x329   : > { %v2410_v28 = vpop.f32.mrb[22].mxu1 }
 0x32a   : > { %v1558_v29 = vadd.f32 %v2410_v28, %v1382_v35  ;;  %v1552_v7 = vpop.f32.mrb[23].mxu1 }
 0x32b   : > { %v1553_v9 = vadd.f32 %v1552_v7, %v1377_v22 }
 0x32c   : > { %v3863_v1 = vmul.f32 %v1558_v29, %v3818_v14  ;;  %v1407_v14 = vpop.permute.xlu1 %1406 }
 0x32d   : > { %v3866_v13 = vmul.f32 %v1553_v9, %v3820_v19 }
 0x32e   : > { %1631 = vmax.xlane.f32.xlu0 %v3863_v1 }
 0x32f   : > { %1629 = vmax.xlane.f32.xlu1 %v3866_v13 }
 0x330   : > { %v1412_v6 = vpop.permute.xlu1 %1411 }
 0x331   : > { %v2413_v17 = vpop.f32.mrb[24].mxu1 }
 0x332   : > { %v1568_v15 = vadd.f32 %v2413_v17, %v1392_v3  ;;  %v1562_v49 = vpop.f32.mrb[25].mxu1 }
 0x333   : > { %v1563_v21 = vadd.f32 %v1562_v49, %v1387_v33 }
 0x334   : > { %v3871_v23 = vmul.f32 %v1568_v15, %v3822_v38  ;;  %v1417_v35 = vpop.permute.xlu1 %1416 }
 0x335   : > { %v3874_v52 = vmul.f32 %v1563_v21, %v3824_v39 }
 0x336   : > { %1635 = vmax.xlane.f32.xlu0 %v3871_v23 }
 0x337   : > { %1633 = vmax.xlane.f32.xlu1 %v3874_v52 }
 0x339   : > { %v2416_v19 = vpop.f32.mrb[26].mxu1 }
 0x33a   : > { %v1578_v25 = vadd.f32 %v2416_v19, %v1402_v63  ;;  %v1572_v27 = vpop.f32.mrb[27].mxu1 }
 0x33b   : > { %v1573_v31 = vadd.f32 %v1572_v27, %v1397_v8 }
 0x33c   : > { %v3879_v32 = vmul.f32 %v1578_v25, %v3826_v42  ;;  %v1422_v42 = vpop.permute.xlu1 %1421 }
 0x33d   : > { %v3882_v22 = vmul.f32 %v1573_v31, %v3828_v43 }
 0x33e   : > { %1639 = vmax.xlane.f32.xlu0 %v3879_v32 }
 0x33f   : > { %1637 = vmax.xlane.f32.xlu1 %v3882_v22 }
 0x341   : > { %v2419_v38 = vpop.f32.mrb[28].mxu1 }
 0x342   : > { %v1588_v39 = vadd.f32 %v2419_v38, %v1412_v6  ;;  %v1582_v37 = vpop.f32.mrb[29].mxu1 }
 0x343   : > { %v1583_v48 = vadd.f32 %v1582_v37, %v1407_v14 }
 0x344   : > { %v3887_v26 = vmul.f32 %v1588_v39, %v3830_v11 }
 0x345   : > { %v3890_v51 = vmul.f32 %v1583_v48, %v3832_v12 }
 0x346   : > { %1643 = vmax.xlane.f32.xlu0 %v3887_v26 }
 0x347   : > { %1641 = vmax.xlane.f32.xlu1 %v3890_v51 }
 0x349   : > { %v2422_v43 = vpop.f32.mrb[30].mxu1 }
 0x34a   : > { %v1598_v60 = vadd.f32 %v2422_v43, %v1422_v42  ;;  %v1592_v33 = vpop.f32.mrb[31].mxu1 }
 0x34b   : > { %v1593_v45 = vadd.f32 %v1592_v33, %v1417_v35 }
 0x34c   : > { %v3895_v57 = vmul.f32 %v1598_v60, %v3834_v47 }
 0x34d   : > { %v3898_v61 = vmul.f32 %v1593_v45, %v3836_v20 }
 0x34e   : > { %1647 = vmax.xlane.f32.xlu0 %v3895_v57 }
 0x34f   : > { %1645 = vmax.xlane.f32.xlu1 %v3898_v61 }
 0x3a3   : > { %v1620_v11 = vpop.xlane.xlu1 %1619 }
 0x3a4   : > { %v1650_v12 = vsub.f32 %v3839_v54, %v1620_v11  ;;  %v1618_v0 = vpop.xlane.xlu0 %1617 }
 0x3a5   : > { %v1649_v3 = vsub.f32 %v3842_v41, %v1618_v0 }
 0x3a6   : > { %v1667_v28 = vmul.f32 1.442695, %v1650_v12 }
 0x3a7   : > { %v1665_v29 = vmul.f32 1.442695, %v1649_v3 }
 0x3a8   : > { %2859 = vpow2.f32 %v1667_v28 }
 0x3a9   : > { %2861 = vpow2.f32 %v1665_v29 }
 0x3ab   : > { %v1624_v7 = vpop.xlane.xlu1 %1623 }
 0x3ac   : > { %v1652_v47 = vsub.f32 %v3847_v53, %v1624_v7 }
 0x3ae   : > { %v1671_v8 = vmul.f32 1.442695, %v1652_v47 }
 0x3af   : > { %v1622_v20 = vpop.xlane.xlu1 %1621 }
 0x3b0   : > { %2863 = vpow2.f32 %v1671_v8  ;;  %v1651_v9 = vsub.f32 %v3850_v56, %v1622_v20 }
 0x3b2   : > { %v3906_v63 = vpop.eup %2859  ;;  %v1669_v17 = vmul.f32 1.442695, %v1651_v9 }
 0x3b3   : > { %v3908_v15 = vpop.eup %2861  ;;  %1699 = vadd.xlane.f32.xlu0 %v3906_v63  ;;  %v1628_v54 = vpop.xlane.xlu0 %1627 }
 0x3b4   : > { %2865 = vpow2.f32 %v1669_v17  ;;  %v1654_v41 = vsub.f32 %v3855_v18, %v1628_v54  ;;  %v1626_v49 = vpop.xlane.xlu1 %1625  ;;  %1697 = vadd.xlane.f32.xlu1 %v3908_v15 }
 0x3b5   : > { %v1653_v53 = vsub.f32 %v3858_v36, %v1626_v49 }
 0x3b6   : > { %v1675_v21 = vmul.f32 1.442695, %v1654_v41 }
 0x3b7   : > { %v1673_v14 = vmul.f32 1.442695, %v1653_v53 }
 0x3b8   : > { %2867 = vpow2.f32 %v1675_v21 }
 0x3b9   : > { %2869 = vpow2.f32 %v1673_v14 }
 0x3ba   : > { %v3914_v56 = vpop.eup %2863 }
 0x3bb   : > { %1703 = vadd.xlane.f32.xlu0 %v3914_v56  ;;  %v1632_v19 = vpop.xlane.xlu0 %1631 }
 0x3bc   : > { %v1656_v25 = vsub.f32 %v3863_v1, %v1632_v19  ;;  %v1630_v27 = vpop.xlane.xlu1 %1629 }
 0x3bd   : > { %v1655_v31 = vsub.f32 %v3866_v13, %v1630_v27 }
 0x3be   : > { %v3919_v18 = vpop.eup %2865  ;;  %v1679_v6 = vmul.f32 1.442695, %v1656_v25 }
 0x3bf   : > { %v1677_v38 = vmul.f32 1.442695, %v1655_v31  ;;  %1701 = vadd.xlane.f32.xlu1 %v3919_v18 }
 0x3c0   : > { %2871 = vpow2.f32 %v1679_v6 }
 0x3c1   : > { %2873 = vpow2.f32 %v1677_v38 }
 0x3c2   : > { %v3922_v36 = vpop.eup %2867 }
 0x3c3   : > { %v3924_v39 = vpop.eup %2869  ;;  %1707 = vadd.xlane.f32.xlu0 %v3922_v36  ;;  %v1636_v37 = vpop.xlane.xlu0 %1635 }
 0x3c4   : > { %v1658_v1 = vsub.f32 %v3871_v23, %v1636_v37  ;;  %v1634_v35 = vpop.xlane.xlu1 %1633  ;;  %1705 = vadd.xlane.f32.xlu1 %v3924_v39 }
 0x3c5   : > { %v1657_v13 = vsub.f32 %v3874_v52, %v1634_v35 }
 0x3c6   : > { %v1683_v48 = vmul.f32 1.442695, %v1658_v1 }
 0x3c7   : > { %v1681_v42 = vmul.f32 1.442695, %v1657_v13 }
 0x3c8   : > { %2875 = vpow2.f32 %v1683_v48 }
 0x3c9   : > { %2877 = vpow2.f32 %v1681_v42 }
 0x3ca   : > { %v3930_v43 = vpop.eup %2871 }
 0x3cb   : > { %v3932_v60 = vpop.eup %2873  ;;  %1711 = vadd.xlane.f32.xlu0 %v3930_v43  ;;  %v1640_v33 = vpop.xlane.xlu0 %1639 }
 0x3cc   : > { %v1660_v45 = vsub.f32 %v3879_v32, %v1640_v33  ;;  %v1638_v11 = vpop.xlane.xlu1 %1637  ;;  %1709 = vadd.xlane.f32.xlu1 %v3932_v60 }
 0x3cd   : > { %v1659_v23 = vsub.f32 %v3882_v22, %v1638_v11 }
 0x3ce   : > { %v1687_v12 = vmul.f32 1.442695, %v1660_v45 }
 0x3cf   : > { %v1685_v52 = vmul.f32 1.442695, %v1659_v23 }
 0x3d0   : > { %2879 = vpow2.f32 %v1687_v12 }
 0x3d1   : > { %2881 = vpow2.f32 %v1685_v52 }
 0x3d2   : > { %v3938_v0 = vpop.eup %2875 }
 0x3d3   : > { %v3940_v3 = vpop.eup %2877  ;;  %1715 = vadd.xlane.f32.xlu0 %v3938_v0  ;;  %v1644_v28 = vpop.xlane.xlu0 %1643 }
 0x3d4   : > { %v1662_v29 = vsub.f32 %v3887_v26, %v1644_v28  ;;  %v1642_v7 = vpop.xlane.xlu1 %1641  ;;  %1713 = vadd.xlane.f32.xlu1 %v3940_v3 }
 0x3d5   : > { %v1661_v32 = vsub.f32 %v3890_v51, %v1642_v7 }
 0x3d6   : > { %v1691_v47 = vmul.f32 1.442695, %v1662_v29 }
 0x3d7   : > { %v1689_v22 = vmul.f32 1.442695, %v1661_v32 }
 0x3d8   : > { %2883 = vpow2.f32 %v1691_v47 }
 0x3d9   : > { %2885 = vpow2.f32 %v1689_v22 }
 0x3da   : > { %v3946_v8 = vpop.eup %2879 }
 0x3db   : > { %v3948_v20 = vpop.eup %2881  ;;  %1719 = vadd.xlane.f32.xlu0 %v3946_v8  ;;  %v1648_v9 = vpop.xlane.xlu0 %1647 }
 0x3dc   : > { %v1664_v17 = vsub.f32 %v3895_v57, %v1648_v9  ;;  %v1646_v54 = vpop.xlane.xlu1 %1645  ;;  %1717 = vadd.xlane.f32.xlu1 %v3948_v20 }
 0x3dd   : > { %v1663_v26 = vsub.f32 %v3898_v61, %v1646_v54 }
 0x3de   : > { %v1695_v41 = vmul.f32 1.442695, %v1664_v17 }
 0x3df   : > { %v1693_v51 = vmul.f32 1.442695, %v1663_v26 }
 0x3e0   : > { %2887 = vpow2.f32 %v1695_v41 }
 0x3e1   : > { %2889 = vpow2.f32 %v1693_v51 }
 0x3e2   : > { %v3954_v49 = vpop.eup %2883 }
 0x3e3   : > { %v3956_v53 = vpop.eup %2885  ;;  %1723 = vadd.xlane.f32.xlu0 %v3954_v49 }
 0x3e4   : > { %1721 = vadd.xlane.f32.xlu1 %v3956_v53 }
 0x3ea   : > { %v3960_v21 = vpop.eup %2887 }
 0x3eb   : > { %v3962_v57 = vpop.eup %2889  ;;  %1727 = vadd.xlane.f32.xlu0 %v3960_v21 }
 0x3ec   : > { %1725 = vadd.xlane.f32.xlu1 %v3962_v57 }
 0x440   : > { %v1700_v61 = vpop.xlane.xlu0 %1699 }
 0x441   : > { %2891 = vrcp.f32 %v1700_v61  ;;  %v1698_v14 = vpop.xlane.xlu1 %1697 }
 0x442   : > { %2893 = vrcp.f32 %v1698_v14 }
 0x448   : > { %v1704_v19 = vpop.xlane.xlu0 %1703 }
 0x449   : > { %2895 = vrcp.f32 %v1704_v19 }
 0x44b   : > { %v2892_v25 = vpop.eup %2891 }
 0x44c   : > { %v2894_v27 = vpop.eup %2893  ;;  %v1746_v31 = vmul.f32 %v2892_v25, %v3906_v63  ;;  %v1702_v6 = vpop.xlane.xlu1 %1701 }
 0x44d   : > { %v1745_v38 = vmul.f32 %v2894_v27, %v3908_v15  ;;  %2897 = vrcp.f32 %v1702_v6 }
 0x44e   : > { %1762 = vst [vmem:[%s3969_s4 + $0x8] sm:$0xff] %v1746_v31  ;;  %v1778_v37 = vmul.f32 %v1746_v31, %v3644_v59 }
 0x44f   : > { %1761 = vst [vmem:[%s3969_s4] sm:$0xff] %v1745_v38  ;;  %v1777_v1 = vmul.f32 %v1745_v38, %v3635_v46 }
 0x450   : > { %1794 = vst [vmem:[%s3976_s16 + $0x8] sm:$0xff] %v1778_v37  ;;  %v1708_v63 = vpop.xlane.xlu0 %1707 }
 0x451   : > { %1793 = vst [vmem:[%s3976_s16] sm:$0xff] %v1777_v1  ;;  %2899 = vrcp.f32 %v1708_v63  ;;  %v1706_v15 = vpop.xlane.xlu1 %1705 }
 0x452   : > { %2901 = vrcp.f32 %v1706_v15 }
 0x453   : > { %v2896_v35 = vpop.eup %2895 }
 0x454   : > { %v1748_v13 = vmul.f32 %v2896_v35, %v3914_v56 }
 0x456   : > { %1764 = vst [vmem:[%s3969_s4 + $0x18] sm:$0xff] %v1748_v13  ;;  %v1780_v46 = vmul.f32 %v1748_v13, %v3652_v16 }
 0x457   : > { %v2898_v59 = vpop.eup %2897 }
 0x458   : > { %1796 = vst [vmem:[%s3976_s16 + $0x18] sm:$0xff] %v1780_v46  ;;  %v1747_v48 = vmul.f32 %v2898_v59, %v3919_v18  ;;  %v1712_v42 = vpop.xlane.xlu0 %1711 }
 0x459   : > { %2903 = vrcp.f32 %v1712_v42  ;;  %v1710_v33 = vpop.xlane.xlu1 %1709 }
 0x45a   : > { %1763 = vst [vmem:[%s3969_s4 + $0x10] sm:$0xff] %v1747_v48  ;;  %v1779_v45 = vmul.f32 %v1747_v48, %v3647_v2  ;;  %2905 = vrcp.f32 %v1710_v33 }
 0x45b   : > { %v2900_v11 = vpop.eup %2899 }
 0x45c   : > { %v2902_v56 = vpop.eup %2901  ;;  %1795 = vst [vmem:[%s3976_s16 + $0x10] sm:$0xff] %v1779_v45  ;;  %v1750_v23 = vmul.f32 %v2900_v11, %v3922_v36 }
 0x45d   : > { %v1749_v16 = vmul.f32 %v2902_v56, %v3924_v39 }
 0x45e   : > { %1766 = vst [vmem:[%s3969_s4 + $0x28] sm:$0xff] %v1750_v23  ;;  %v1782_v18 = vmul.f32 %v1750_v23, %v3664_v44 }
 0x45f   : > { %1765 = vst [vmem:[%s3969_s4 + $0x20] sm:$0xff] %v1749_v16  ;;  %v1781_v12 = vmul.f32 %v1749_v16, %v3657_v24 }
 0x460   : > { %1798 = vst [vmem:[%s3976_s16 + $0x28] sm:$0xff] %v1782_v18  ;;  %v1716_v2 = vpop.xlane.xlu0 %1715 }
 0x461   : > { %1797 = vst [vmem:[%s3976_s16 + $0x20] sm:$0xff] %v1781_v12  ;;  %2907 = vrcp.f32 %v1716_v2  ;;  %v1714_v52 = vpop.xlane.xlu1 %1713 }
 0x462   : > { %2909 = vrcp.f32 %v1714_v52 }
 0x463   : > { %v2904_v28 = vpop.eup %2903 }
 0x464   : > { %v2906_v36 = vpop.eup %2905  ;;  %v1752_v29 = vmul.f32 %v2904_v28, %v3930_v43 }
 0x465   : > { %v1751_v39 = vmul.f32 %v2906_v36, %v3932_v60 }
 0x466   : > { %1768 = vst [vmem:[%s3969_s4 + $0x38] sm:$0xff] %v1752_v29  ;;  %v1784_v44 = vmul.f32 %v1752_v29, %v3678_v5 }
 0x467   : > { %1767 = vst [vmem:[%s3969_s4 + $0x30] sm:$0xff] %v1751_v39  ;;  %v1783_v24 = vmul.f32 %v1751_v39, %v3675_v58 }
 0x468   : > { %1800 = vst [vmem:[%s3976_s16 + $0x38] sm:$0xff] %v1784_v44  ;;  %v1720_v7 = vpop.xlane.xlu0 %1719 }
 0x469   : > { %1799 = vst [vmem:[%s3976_s16 + $0x30] sm:$0xff] %v1783_v24  ;;  %2911 = vrcp.f32 %v1720_v7  ;;  %v1718_v32 = vpop.xlane.xlu1 %1717 }
 0x46a   : > { %2913 = vrcp.f32 %v1718_v32 }
 0x46b   : > { %v2908_v47 = vpop.eup %2907 }
 0x46c   : > { %v2910_v43 = vpop.eup %2909  ;;  %v1754_v22 = vmul.f32 %v2908_v47, %v3938_v0 }
 0x46d   : > { %v1753_v60 = vmul.f32 %v2910_v43, %v3940_v3 }
 0x46e   : > { %1770 = vst [vmem:[%s3969_s4 + $0x48] sm:$0xff] %v1754_v22  ;;  %v1786_v5 = vmul.f32 %v1754_v22, %v3691_v30 }
 0x46f   : > { %1769 = vst [vmem:[%s3969_s4 + $0x40] sm:$0xff] %v1753_v60  ;;  %v1785_v58 = vmul.f32 %v1753_v60, %v3685_v10 }
 0x470   : > { %1802 = vst [vmem:[%s3976_s16 + $0x48] sm:$0xff] %v1786_v5  ;;  %v1724_v9 = vpop.xlane.xlu0 %1723 }
 0x471   : > { %1801 = vst [vmem:[%s3976_s16 + $0x40] sm:$0xff] %v1785_v58  ;;  %2915 = vrcp.f32 %v1724_v9  ;;  %v1722_v17 = vpop.xlane.xlu1 %1721 }
 0x472   : > { %2917 = vrcp.f32 %v1722_v17 }
 0x473   : > { %v2912_v54 = vpop.eup %2911 }
 0x474   : > { %v2914_v0 = vpop.eup %2913  ;;  %v1756_v26 = vmul.f32 %v2912_v54, %v3946_v8 }
 0x475   : > { %v1755_v3 = vmul.f32 %v2914_v0, %v3948_v20 }
 0x476   : > { %1772 = vst [vmem:[%s3969_s4 + $0x58] sm:$0xff] %v1756_v26  ;;  %v1788_v30 = vmul.f32 %v1756_v26, %v3703_v50 }
 0x477   : > { %1771 = vst [vmem:[%s3969_s4 + $0x50] sm:$0xff] %v1755_v3  ;;  %v1787_v10 = vmul.f32 %v1755_v3, %v3697_v34 }
 0x478   : > { %1804 = vst [vmem:[%s3976_s16 + $0x58] sm:$0xff] %v1788_v30  ;;  %v1728_v41 = vpop.xlane.xlu0 %1727 }
 0x479   : > { %1803 = vst [vmem:[%s3976_s16 + $0x50] sm:$0xff] %v1787_v10  ;;  %2919 = vrcp.f32 %v1728_v41  ;;  %v1726_v8 = vpop.xlane.xlu1 %1725 }
 0x47a   : > { %2921 = vrcp.f32 %v1726_v8 }
 0x47b   : > { %v2916_v51 = vpop.eup %2915 }
 0x47c   : > { %v2918_v20 = vpop.eup %2917  ;;  %v1758_v61 = vmul.f32 %v2916_v51, %v3954_v49 }
 0x47d   : > { %v1757_v50 = vmul.f32 %v2918_v20, %v3956_v53 }
 0x47e   : > { %1774 = vst [vmem:[%s3969_s4 + $0x68] sm:$0xff] %v1758_v61  ;;  %v1790_v34 = vmul.f32 %v1758_v61, %v3718_v62 }
 0x47f   : > { %1773 = vst [vmem:[%s3969_s4 + $0x60] sm:$0xff] %v1757_v50  ;;  %v1789_v14 = vmul.f32 %v1757_v50, %v3712_v55 }
 0x480   : > { %1806 = vst [vmem:[%s3976_s16 + $0x68] sm:$0xff] %v1790_v34 }
 0x481   : > { %1805 = vst [vmem:[%s3976_s16 + $0x60] sm:$0xff] %v1789_v14 }
 0x483   : > { %v2920_v19 = vpop.eup %2919 }
 0x484   : > { %v2922_v49 = vpop.eup %2921  ;;  %v1760_v53 = vmul.f32 %v2920_v19, %v3960_v21 }
 0x485   : > { %v1759_v25 = vmul.f32 %v2922_v49, %v3962_v57 }
 0x486   : > { %1776 = vst [vmem:[%s3969_s4 + $0x78] sm:$0xff] %v1760_v53  ;;  %v1792_v55 = vmul.f32 %v1760_v53, %v3730_v4 }
 0x487   : > { %1775 = vst [vmem:[%s3969_s4 + $0x70] sm:$0xff] %v1759_v25  ;;  %v1791_v62 = vmul.f32 %v1759_v25, %v3721_v40 }
 0x488   : > { %1808 = vst [vmem:[%s3976_s16 + $0x78] sm:$0xff] %v1792_v55 }
 0x489   : > { %3053 = shalt.err (!%p3050_p11)
}
 0x48a   : > { %s3054_s27 = scalar_lea.hbm %s4036_s17, 2048  ;;  %s3058_s22 = scalar_lea.hbm %s4133_s9, 8192 }
 0x48b   : > { %p3055_p0 = scmp.ne.s32.totalorder %s4036_s17, %s3054_s27  ;;  %p3059_p13 = scmp.lt.u32.totalorder %s4036_s17, %s4133_s9 }
 0x48c   : > { %p3060_p3 = scmp.lt.u32.totalorder %s3058_s22, %s3054_s27  ;;  %p3062_p9 = scmp.lt.u32.totalorder %s3054_s27, %s4036_s17 }
 0x48d   : > { %p3056_p2 = pnand %p3055_p0, %p3331_p6 }
 0x48e   : > { %p3061_p7 = por %p3060_p3, %p3059_p13 }
 0x48f   : > { %p3057_p10 = pneg %p3056_p2 }
 0x490   : > { %p3063_p12 = por %p3062_p9, %p3061_p7 }
 0x492   : > { %p3064_p5 = pnand %p3063_p12, %p3057_p10 }
 0x494   : > { %3067 = shalt.err (!%p3064_p5)
}
 0x495   : > { %s3160_s13 = smov 128   ;;  %s3161_s14 = smov 8   ;;  %1807 = vst [vmem:[%s3976_s16 + $0x70] sm:$0xff] %v1791_v62 }
 0x496   : > { %2564 = dma.vmem_to_hbm [thread:$0]  (%p3331_p6), %s4038_s25, 2048, %s4036_s17, %s1815_s19, %s3160_s13, %s3160_s13, %s3161_s14  }
 0x497   : > { %s1810_s28 = scalar_lea.sflag [#allocation4], %s3426_s18  ;;  %s3068_s23 = scalar_lea.vmem %s4049_s0, 2048 }
 0x498   : > { %p3069_p1 = scmp.ne.s32.totalorder %s4049_s0, %s3068_s23  ;;  %s3162_s21 = smov [#allocation10]  }
 0x499   : > { %s3072_s11 = sshll.u32 %s3162_s21, 4  ;;  %s3073_s11 = int_to_ptr.vmem [resolvable:$false] %s3072_s11 }
 0x49a   : > { %p3070_p4 = pnand %p3069_p1, %p3331_p6  ;;  %s3074_s27 = scalar_lea.vmem %s3073_s11, 4096 }
 0x49b   : > { %p3075_p11 = scmp.lt.s32.totalorder %s4049_s0, %s3073_s11  ;;  %p3076_p0 = scmp.lt.s32.totalorder %s3074_s27, %s3068_s23 }
 0x49c   : > { %p3071_p8 = pneg %p3070_p4 }
 0x49d   : > { %p3077_p2 = por %p3076_p0, %p3075_p11 }
 0x49f   : > { %p3078_p10 = pnand %p3077_p2, %p3071_p8 }
 0x4a1   : > { %3081 = shalt.err (!%p3078_p10)
}
 0x4a2   : > { %s3082_s16 = scalar_lea.hbm %s4047_s15, 2048  ;;  %s3086_s19 = scalar_lea.hbm %s4132_s8, 8192 }
 0x4a3   : > { %p3083_p13 = scmp.ne.s32.totalorder %s4047_s15, %s3082_s16  ;;  %p3087_p9 = scmp.lt.u32.totalorder %s4047_s15, %s4132_s8 }
 0x4a4   : > { %p3088_p12 = scmp.lt.u32.totalorder %s3086_s19, %s3082_s16  ;;  %p3090_p1 = scmp.lt.u32.totalorder %s3082_s16, %s4047_s15 }
 0x4a5   : > { %p3084_p3 = pnand %p3083_p13, %p3331_p6 }
 0x4a6   : > { %p3089_p5 = por %p3088_p12, %p3087_p9 }
 0x4a7   : > { %p3085_p7 = pneg %p3084_p3 }
 0x4a8   : > { %p3091_p4 = por %p3090_p1, %p3089_p5 }
 0x4aa   : > { %p3092_p8 = pnand %p3091_p4, %p3085_p7 }
 0x4ac   : > { %3095 = shalt.err (!%p3092_p8)
}
 0x4ad   : > { %2563 = dma.vmem_to_hbm [thread:$0]  (%p3331_p6), %s4049_s0, 2048, %s4047_s15, %s1810_s28, %s3160_s13, %s3160_s13, %s3161_s14  }
 0x4ae PF: > { %s4167_s22 = sld [smem:[#allocation20_spill]]  ;;  %p2593_p11 = scmp.ge.s32.totalorder %s3150_s12, 2 }
 0x4af   : > { %s1859_s24 = sand.u32 1, %s3138_s30  }
 0x4b0   : > { %s1860_s3 = scalar_lea.sflag [#allocation4], %s1859_s24 }
 0x4b4   : > { %p4168_p0 = scmp.ne.s32.totalorder %s4167_s22, 0 }
 0x4b6   : > { %p2582_p2 = pnand %p2593_p11, %p4168_p0 }
 0x4b8   : > { %3129 = dma.done.wait (!%p2582_p2), %s1860_s3, 2048  }
 0x4b9   : > { %3131 = vsyncadd (!%p2582_p2), %s1860_s3, 4294965248  ;;  %s1869_s26 = scalar_lea.sflag [#allocation12], %s1859_s24 }
 0x4ba   : > { %3133 = dma.done.wait (!%p2582_p2), %s1869_s26, 2048  }
 0x4bb   : > { %3135 = vsyncadd (!%p2582_p2), %s1869_s26, 4294965248  ;;  %s4169_s18 = sld [smem:[#allocation19_spill]]  ;;  %s4170_s11 = sld [smem:[#allocation21_spill]] }
 0x4bc   : > { %p30_p6 = scmp.ge.s32.totalorder %s3321_s20, 6   ;;  %s4171_s30 = smov %s3142_s10 }
 0x4bd   : > { %s4173_s12 = smov %s3321_s20 }
 0x4be   :  { %32 = sbr.rel (!%p30_p6) target bundleno = 14 (0xe), region = 135 }
 0x4c1   : > { %s4172_s10 = smov %s4169_s18 }
 0x4c5   :  { %1874 = vsyncpa [#allocation3], 1 }
 0x4c6   :  { %1876 = vsyncpa [#allocation3 + $0x1], 1 }
 0x4c7   :  { %1877 = vsyncpa [#allocation6], 1 }
 0x4c8   :  { %1879 = vsyncpa [#allocation6 + $0x1], 1 }
 0x4c9   :  { %1880 = vsyncpa [#allocation9], 1 }
 0x4ca   :  { %1881 = vsyncpa [#allocation4], 1 }
 0x4cb   :  { %1883 = vsyncpa [#allocation4 + $0x1], 1 }
 0x4cc   :  { %1884 = vsyncpa [#allocation12], 1 }
 0x4cd   :  { %1886 = vsyncpa [#allocation12 + $0x1], 1 }

</bundles_post_ra>
